<compile_context>
chip_gen: v7x
topology: tpu7x:2x2x1
jax: 0.10.0
libtpu: 0.0.40
codegen_flags: <defaults>
</compile_context>

<pallas_src>
import functools

import jax
import jax.numpy as jnp
from jax.experimental import pallas as pl
from jax.experimental.pallas import tpu as pltpu


# -----------------------------------------------------------------------------
# Kernel 1: patch embedding  (patches @ W + b), row-tiled over B*P
# -----------------------------------------------------------------------------
def _patch_embed_kernel(p_ref, w_ref, b_ref, o_ref):
    acc = jnp.dot(p_ref[...], w_ref[...], preferred_element_type=jnp.float32)
    o_ref[...] = (acc + b_ref[...]).astype(o_ref.dtype)


def patch_embed(patches_2d, w, b, *, block_rows=512):
    # patches_2d: (M, patch_dim) bf16, w: (patch_dim, D) bf16, b: (1, D) f32
    M, K = patches_2d.shape
    D = w.shape[1]

    if M <= block_rows:
        tm = M                                   # single full-extent block
    else:
        tm = block_rows                          # prefer a tile dividing M ->
        while M % tm != 0 and tm > 128:          # no padding copy of the patches
            tm //= 2
        if M % tm != 0:
            tm = block_rows

    Mp = pl.cdiv(M, tm) * tm
    src = patches_2d if Mp == M else jnp.pad(patches_2d, ((0, Mp - M), (0, 0)))

    out = pl.pallas_call(
        _patch_embed_kernel,
        out_shape=jax.ShapeDtypeStruct((Mp, D), jnp.bfloat16),
        grid=(Mp // tm,),
        in_specs=[
            pl.BlockSpec((tm, K), lambda i: (i, 0)),
            pl.BlockSpec((K, D), lambda i: (0, 0)),
            pl.BlockSpec((1, D), lambda i: (0, 0)),
        ],
        out_specs=pl.BlockSpec((tm, D), lambda i: (i, 0)),
        compiler_params=pltpu.CompilerParams(dimension_semantics=("parallel",)),
    )(src, w, b)
    return out if Mp == M else out[:M]


# -----------------------------------------------------------------------------
# Kernel 2: fused sequence-build + ViT encoder block + final LN + CLS pooling
#           + L2-norm + zero-shot logits
# -----------------------------------------------------------------------------
def _layernorm(h, g, b, eps=1e-5):
    mu = jnp.mean(h, axis=-1, keepdims=True)
    var = jnp.mean((h - mu) ** 2, axis=-1, keepdims=True)
    return (h - mu) * jax.lax.rsqrt(var + eps) * g + b


def _encoder_logits_kernel(
    emb_ref,      # (1, P, D)      bf16   patch embeddings of this image
    base_ref,     # (1, S_pad, D)  f32    row0 = cls+pos0, rows 1..P = pos, rest 0
    wqkv_ref,     # (D, 3D)        bf16   fused Q/K/V projection
    wo_ref,       # (D, D)         bf16
    w1_ref,       # (D, 4D)        bf16
    b1_ref,       # (1, 4D)        f32
    w2_ref,       # (4D, D)        bf16
    misc_ref,     # (8, D)         f32    packed 1-D params
    txt_ref,      # (NCp, D)       bf16   L2-normalized text embeddings (padded)
    o_ref,        # (1, 1, NCp)    f32    logits row
    x_scr,        # (S_pad, D)     f32    VMEM scratch: token sequence / residual
    *,
    s_valid,      # python int: real sequence length (<= S_pad)
):
    f32, bf16 = jnp.float32, jnp.bfloat16
    S_pad, D = x_scr.shape
    P = emb_ref.shape[1]

    # --- build token sequence in VMEM (fused CLS-concat + pos-embed add) ------
    x_scr[...] = base_ref[0]                                        # cls/pos base
    x_scr[1:1 + P, :] = x_scr[1:1 + P, :] + emb_ref[0].astype(f32)  # + patch emb
    x = x_scr[...]                                                  # (S_pad, D) f32

    ln1_g = misc_ref[0:1, :]; ln1_b = misc_ref[1:2, :]
    ln2_g = misc_ref[2:3, :]; ln2_b = misc_ref[3:4, :]
    b2    = misc_ref[4:5, :]
    lnf_g = misc_ref[5:6, :]; lnf_b = misc_ref[6:7, :]

    # --- pre-LN + fused QKV projection over the full (padded) sequence --------
    h = _layernorm(x, ln1_g, ln1_b).astype(bf16)                    # (S_pad, D)
    qkv = jnp.dot(h, wqkv_ref[...], preferred_element_type=f32)     # (S_pad, 3D)
    q_cls = qkv[0:1, 0:D].astype(bf16)                              # CLS query only
    k = qkv[:, D:2 * D].astype(bf16)                                # (S_pad, D)
    v = qkv[:, 2 * D:3 * D].astype(bf16)                            # (S_pad, D)

    # --- attention for the CLS row only; padded keys masked --------------------
    s = jax.lax.dot_general(q_cls, k, (((1,), (1,)), ((), ())),
                            preferred_element_type=f32)             # (1, S_pad)
    s = s * (1.0 / (D ** 0.5))
    key_idx = jax.lax.broadcasted_iota(jnp.int32, s.shape, 1)
    s = jnp.where(key_idx < s_valid, s, -jnp.inf)
    s = s - jnp.max(s, axis=-1, keepdims=True)
    e = jnp.exp(s)
    p = e * pl.reciprocal(jnp.sum(e, axis=-1, keepdims=True), approx=True)
    attn = jnp.dot(p.astype(bf16), v, preferred_element_type=f32)   # (1, D)

    # --- post-attention path on the CLS row only (rows 1..S are dead) ---------
    x_cls = x[0:1, :] + jnp.dot(attn.astype(bf16), wo_ref[...],
                                preferred_element_type=f32)          # (1, D) f32

    h2 = _layernorm(x_cls, ln2_g, ln2_b).astype(bf16)
    m = jnp.dot(h2, w1_ref[...], preferred_element_type=f32) + b1_ref[...]
    m = jax.nn.gelu(m, approximate=True)                             # tanh -> EUP
    x_cls = x_cls + jnp.dot(m.astype(bf16), w2_ref[...],
                            preferred_element_type=f32) + b2

    # --- final encoder LayerNorm, CLS pooling, L2-normalize, logits -----------
    cls = _layernorm(x_cls, lnf_g, lnf_b)                            # (1, D)
    inv_norm = jax.lax.rsqrt(jnp.sum(cls * cls, axis=-1, keepdims=True) + 1e-12)
    cls_n = (cls * inv_norm).astype(bf16)
    logits = 100.0 * jax.lax.dot_general(
        cls_n, txt_ref[...], (((1,), (1,)), ((), ())),
        preferred_element_type=f32)                                  # (1, NCp)
    o_ref[0] = logits


def encoder_block_with_logits(emb, params):
    # emb: (B, P, D) bf16 patch embeddings ; returns (B, 1, NC_pad) f32 logits
    B, P, D = emb.shape
    base = params["seq_base"]                     # (1, S_pad, D) f32
    S_pad = base.shape[1]
    s_valid = P + 1
    H4 = params["w1"].shape[1]
    NCp = params["text_emb"].shape[0]

    # At real FLAVA sizes the resident weights must be single-buffered
    # (constant index_map -> no "next" tile ever prefetched) to fit VMEM.
    single_buf = D >= 512

    def wspec(r, c):
        if single_buf:
            return pl.BlockSpec((r, c), lambda b: (0, 0),
                                pipeline_mode=pl.Buffered(1))
        return pl.BlockSpec((r, c), lambda b: (0, 0))

    in_specs = [
        pl.BlockSpec((1, P, D), lambda b: (b, 0, 0)),       # emb (per-image)
        pl.BlockSpec((1, S_pad, D), lambda b: (0, 0, 0)),   # cls/pos base
        wspec(D, 3 * D),                                    # fused w_qkv
        wspec(D, D),                                        # wo
        wspec(D, H4),                                       # w1
        wspec(1, H4),                                       # b1
        wspec(H4, D),                                       # w2
        wspec(8, D),                                        # packed 1-D params
        wspec(NCp, D),                                      # text embeddings
    ]
    out_spec = pl.BlockSpec((1, 1, NCp), lambda b: (b, 0, 0))

    # Explicit VMEM budget when the resident weights outgrow the default scoped
    # limit (16 MiB on v5e).  bf16 weights + f32 small params + activations.
    bytes_w = 2 * (D * 3 * D + D * D + D * H4 + H4 * D + NCp * D)
    bytes_small = 4 * (H4 + 8 * D + S_pad * D)
    need = (1 if single_buf else 2) * bytes_w + 2 * bytes_small + (2 << 20)
    vmem_limit = min(int(need * 3 // 2), 48 << 20) if need > (16 << 20) else None

    kernel = functools.partial(_encoder_logits_kernel, s_valid=s_valid)
    return pl.pallas_call(
        kernel,
        out_shape=jax.ShapeDtypeStruct((B, 1, NCp), jnp.float32),
        grid=(B,),
        in_specs=in_specs,
        out_specs=out_spec,
        scratch_shapes=[pltpu.VMEM((S_pad, D), jnp.float32)],
        compiler_params=pltpu.CompilerParams(
            dimension_semantics=("parallel",),
            vmem_limit_bytes=vmem_limit),
    )(
        emb, base,
        params["w_qkv"], params["wo"],
        params["w1"], params["b1"], params["w2"],
        params["misc"], params["text_emb"],
    )


# -----------------------------------------------------------------------------
# Model wrapper
# -----------------------------------------------------------------------------
def init_params(key, *, channels, patch, hidden, num_patches, num_classes):
    f32, bf16 = jnp.float32, jnp.bfloat16
    patch_dim = channels * patch * patch
    seq = num_patches + 1
    seq_pad = ((seq + 7) // 8) * 8                       # full-vreg sublanes
    nc_pad = max(128, ((num_classes + 127) // 128) * 128)  # lane-dense classes
    ks = jax.random.split(key, 12)
    s = 0.02

    w_patch = s * jax.random.normal(ks[0], (patch_dim, hidden), f32)
    b_patch = jnp.zeros((1, hidden), f32)

    # Feature-extractor preprocessing constants (FLAVA/CLIP-style mean/std),
    # folded exactly into the linear patch embedding:
    #   ((x - mean)/std) @ W + b  ==  x @ (W/std) + (b - (mean/std) @ W)
    base_mean = jnp.array([0.48145466, 0.4578275, 0.40821073], f32)
    base_std = jnp.array([0.26862954, 0.26130258, 0.27577711], f32)
    img_mean = jnp.resize(base_mean, (channels,))
    img_std = jnp.resize(base_std, (channels,))
    per_elem_std = jnp.repeat(img_std, patch * patch).reshape(patch_dim, 1)
    per_elem_mean = jnp.repeat(img_mean, patch * patch).reshape(1, patch_dim)
    w_eff = w_patch / per_elem_std
    b_eff = b_patch - per_elem_mean @ w_eff

    # CLS token + positional embedding, precombined into the padded
    # "sequence base" consumed by the fused encoder kernel:
    #   row 0 = cls + pos[0], rows 1..P = pos[1..P], rows > P = 0 (masked keys)
    cls = s * jax.random.normal(ks[1], (1, 1, hidden), f32)
    pos = s * jax.random.normal(ks[2], (1, seq, hidden), f32)
    seq_base = jnp.zeros((1, seq_pad, hidden), f32)
    seq_base = seq_base.at[:, :seq, :].set(pos)
    seq_base = seq_base.at[:, 0, :].add(cls[:, 0, :])

    wq = s * jax.random.normal(ks[3], (hidden, hidden), f32)
    wk = s * jax.random.normal(ks[4], (hidden, hidden), f32)
    wv = s * jax.random.normal(ks[5], (hidden, hidden), f32)
    w_qkv = jnp.concatenate([wq, wk, wv], axis=1)        # (D, 3D) fused

    # Packed 1-D parameters (one DMA instead of six):
    #   rows: ln1_g, ln1_b, ln2_g, ln2_b, b2, final_ln_g, final_ln_b, <unused>
    misc = jnp.zeros((8, hidden), f32)
    misc = misc.at[0].set(1.0).at[2].set(1.0).at[5].set(1.0)

    p = {
        "w_patch": w_eff.astype(bf16),
        "b_patch": b_eff,                                   # f32 bias
        "seq_base": seq_base,                               # f32 cls/pos base
        "w_qkv": w_qkv.astype(bf16),
        "wo": (s * jax.random.normal(ks[6], (hidden, hidden), f32)).astype(bf16),
        "w1": (s * jax.random.normal(ks[7], (hidden, 4 * hidden), f32)).astype(bf16),
        "b1": jnp.zeros((1, 4 * hidden), f32),
        "w2": (s * jax.random.normal(ks[8], (4 * hidden, hidden), f32)).astype(bf16),
        "misc": misc,
    }

    # "__init__" precompute of the text tower: synthetic, L2-normalized rows,
    # zero-padded on the class axis to a multiple of 128 lanes.
    txt = jax.random.normal(ks[9], (num_classes, hidden), f32)
    txt = txt / jnp.linalg.norm(txt, axis=-1, keepdims=True)
    txt_pad = jnp.zeros((nc_pad, hidden), f32).at[:num_classes].set(txt)
    p["text_emb"] = txt_pad.astype(bf16)
    return p


@functools.partial(jax.jit, static_argnames=("patch", "num_classes"))
def flava_zero_shot_forward(x_nchw, params, *, patch, num_classes):
    B, C, H, W = x_nchw.shape
    ph = pw = patch
    P = (H // ph) * (W // pw)
    D = params["w_patch"].shape[1]

    # --- patchify raw pixels (mean/std preprocessing already folded into W,b);
    #     cast to bf16 BEFORE the mem-bound transpose to halve bytes moved.
    xb = x_nchw.astype(jnp.bfloat16)
    patches = xb.reshape(B, C, H // ph, ph, W // pw, pw)
    patches = patches.transpose(0, 2, 4, 1, 3, 5).reshape(B * P, C * ph * pw)

    # --- Pallas: row-tiled patch embedding matmul ---
    emb = patch_embed(patches, params["w_patch"], params["b_patch"])
    emb = emb.reshape(B, P, D)

    # --- Pallas: fused sequence-build + encoder block + final LN + CLS pooling
    #     + L2-norm + zero-shot logits (per-image grid step, CLS-only tail) ---
    logits_pad = encoder_block_with_logits(emb, params)      # (B, 1, NC_pad)
    return logits_pad.reshape(B, -1)[:, :num_classes]


if __name__ == "__main__":
    key = jax.random.PRNGKey(0)
    k_img, k_par = jax.random.split(key)

    B, C, H, W = 2, 3, 16, 16
    PATCH = 8
    HIDDEN = 128
    NUM_CLASSES = 10
    P = (H // PATCH) * (W // PATCH)

    x = jax.random.uniform(k_img, (B, C, H, W), jnp.float32)
    params = init_params(
        k_par, channels=C, patch=PATCH, hidden=HIDDEN,
        num_patches=P, num_classes=NUM_CLASSES,
    )

    logits = flava_zero_shot_forward(x, params, patch=PATCH, num_classes=NUM_CLASSES)
    jax.block_until_ready(logits)
    assert logits.shape == (B, NUM_CLASSES)
    assert bool(jnp.all(jnp.isfinite(logits)))
    print("KERNEL_OK")
</pallas_src>

<mosaic_0001>
module attributes {stable_mosaic.version = 11 : i64} {
  func.func @_patch_embed_kernel(%arg0: i32, %arg1: memref<8x192xbf16, #tpu.memory_space<vmem>>, %arg2: memref<192x128xbf16, #tpu.memory_space<vmem>>, %arg3: memref<1x128xf32, #tpu.memory_space<vmem>>, %arg4: memref<8x128xbf16, #tpu.memory_space<vmem>>) attributes {dimension_semantics = [#tpu.dimension_semantics<parallel>], iteration_bounds = array<i64: 1>, scalar_prefetch = 0 : i64, scratch_operands = 0 : i64, tpu.core_type = #tpu.core_type<tc>, window_params = [{transform_indices = @transform_0, window_bounds = array<i64: 8, 192>}, {pipeline_mode = #tpu.pipeline_mode<synchronous>, transform_indices = @transform_1, window_bounds = array<i64: 192, 128>}, {pipeline_mode = #tpu.pipeline_mode<synchronous>, transform_indices = @transform_2, window_bounds = array<i64: 1, 128>}, {transform_indices = @transform_3, window_bounds = array<i64: 8, 128>}]} {
    %c0 = arith.constant 0 : index
    %c0_0 = arith.constant 0 : index
    %0 = vector.load %arg1[%c0, %c0_0] : memref<8x192xbf16, #tpu.memory_space<vmem>>, vector<8x192xbf16>
    %c0_1 = arith.constant 0 : index
    %c0_2 = arith.constant 0 : index
    %1 = vector.load %arg2[%c0_1, %c0_2] : memref<192x128xbf16, #tpu.memory_space<vmem>>, vector<192x128xbf16>
    %cst = arith.constant dense<0.000000e+00> : vector<8x128xf32>
    %2 = tpu.matmul %0, %1, %cst {dimension_numbers = #tpu.dot_dimension_numbers<[1], [0], [0], [1], [0, 0, 1, 1], [], []>} : vector<8x192xbf16>, vector<192x128xbf16>, vector<8x128xf32> -> vector<8x128xf32>
    %c0_3 = arith.constant 0 : index
    %c0_4 = arith.constant 0 : index
    %3 = vector.load %arg3[%c0_3, %c0_4] : memref<1x128xf32, #tpu.memory_space<vmem>>, vector<1x128xf32>
    %4 = vector.broadcast %3 : vector<1x128xf32> to vector<8x128xf32>
    %5 = arith.addf %2, %4 : vector<8x128xf32>
    %6 = arith.truncf %5 : vector<8x128xf32> to vector<8x128xbf16>
    %c0_5 = arith.constant 0 : index
    %c0_6 = arith.constant 0 : index
    %7 = vector.load %arg4[%c0_5, %c0_6] : memref<8x128xbf16, #tpu.memory_space<vmem>>, vector<8x128xbf16>
    tpu.vector_store %arg4[%c0_5, %c0_6], %6 {strides = array<i32>} : memref<8x128xbf16, #tpu.memory_space<vmem>>, vector<8x128xbf16>,
    return
  }
  func.func @transform_0(%arg0: i32) -> (i32, i32) {
    %c0_i32 = arith.constant 0 : i32
    %c0_i32_0 = arith.constant 0 : i32
    return %arg0, %c0_i32 : i32, i32
  }
  func.func @transform_1(%arg0: i32) -> (i32, i32) {
    %c0_i32 = arith.constant 0 : i32
    %c0_i32_0 = arith.constant 0 : i32
    %c0_i32_1 = arith.constant 0 : i32
    return %c0_i32, %c0_i32_0 : i32, i32
  }
  func.func @transform_2(%arg0: i32) -> (i32, i32) {
    %c0_i32 = arith.constant 0 : i32
    %c0_i32_0 = arith.constant 0 : i32
    %c0_i32_1 = arith.constant 0 : i32
    return %c0_i32, %c0_i32_0 : i32, i32
  }
  func.func @transform_3(%arg0: i32) -> (i32, i32) {
    %c0_i32 = arith.constant 0 : i32
    %c0_i32_0 = arith.constant 0 : i32
    return %arg0, %c0_i32 : i32, i32
  }
}

module attributes {stable_mosaic.version = 11 : i64} {
  func.func @_encoder_logits_kernel(%arg0: i32, %arg1: memref<1x4x128xbf16, #tpu.memory_space<vmem>>, %arg2: memref<1x8x128xf32, #tpu.memory_space<vmem>>, %arg3: memref<128x384xbf16, #tpu.memory_space<vmem>>, %arg4: memref<128x128xbf16, #tpu.memory_space<vmem>>, %arg5: memref<128x512xbf16, #tpu.memory_space<vmem>>, %arg6: memref<1x512xf32, #tpu.memory_space<vmem>>, %arg7: memref<512x128xbf16, #tpu.memory_space<vmem>>, %arg8: memref<8x128xf32, #tpu.memory_space<vmem>>, %arg9: memref<128x128xbf16, #tpu.memory_space<vmem>>, %arg10: memref<1x1x128xf32, #tpu.memory_space<vmem>>, %arg11: memref<8x128xf32, #tpu.memory_space<vmem>>) attributes {dimension_semantics = [#tpu.dimension_semantics<parallel>], iteration_bounds = array<i64: 2>, scalar_prefetch = 0 : i64, scratch_operands = 1 : i64, tpu.core_type = #tpu.core_type<tc>, window_params = [{transform_indices = @transform_0, window_bounds = array<i64: 1, 4, 128>}, {pipeline_mode = #tpu.pipeline_mode<synchronous>, transform_indices = @transform_1, window_bounds = array<i64: 1, 8, 128>}, {pipeline_mode = #tpu.pipeline_mode<synchronous>, transform_indices = @transform_2, window_bounds = array<i64: 128, 384>}, {pipeline_mode = #tpu.pipeline_mode<synchronous>, transform_indices = @transform_3, window_bounds = array<i64: 128, 128>}, {pipeline_mode = #tpu.pipeline_mode<synchronous>, transform_indices = @transform_4, window_bounds = array<i64: 128, 512>}, {pipeline_mode = #tpu.pipeline_mode<synchronous>, transform_indices = @transform_5, window_bounds = array<i64: 1, 512>}, {pipeline_mode = #tpu.pipeline_mode<synchronous>, transform_indices = @transform_6, window_bounds = array<i64: 512, 128>}, {pipeline_mode = #tpu.pipeline_mode<synchronous>, transform_indices = @transform_7, window_bounds = array<i64: 8, 128>}, {pipeline_mode = #tpu.pipeline_mode<synchronous>, transform_indices = @transform_8, window_bounds = array<i64: 128, 128>}, {transform_indices = @transform_9, window_bounds = array<i64: 1, 1, 128>}]} {
    %c0 = arith.constant 0 : index
    %c0_0 = arith.constant 0 : index
    %c0_1 = arith.constant 0 : index
    %0 = vector.load %arg2[%c0, %c0_0, %c0_1] : memref<1x8x128xf32, #tpu.memory_space<vmem>>, vector<1x8x128xf32>
    %1 = vector.shape_cast %0 : vector<1x8x128xf32> to vector<8x128xf32>
    %c0_2 = arith.constant 0 : index
    %c0_3 = arith.constant 0 : index
    %2 = vector.load %arg11[%c0_2, %c0_3] : memref<8x128xf32, #tpu.memory_space<vmem>>, vector<8x128xf32>
    tpu.vector_store %arg11[%c0_2, %c0_3], %1 {strides = array<i32>} : memref<8x128xf32, #tpu.memory_space<vmem>>, vector<8x128xf32>,
    %c1 = arith.constant 1 : index
    %c0_4 = arith.constant 0 : index
    %3 = vector.load %arg11[%c1, %c0_4] : memref<8x128xf32, #tpu.memory_space<vmem>>, vector<4x128xf32>
    %c0_5 = arith.constant 0 : index
    %c0_6 = arith.constant 0 : index
    %c0_7 = arith.constant 0 : index
    %4 = vector.load %arg1[%c0_5, %c0_6, %c0_7] : memref<1x4x128xbf16, #tpu.memory_space<vmem>>, vector<1x4x128xbf16>
    %5 = vector.shape_cast %4 : vector<1x4x128xbf16> to vector<4x128xbf16>
    %6 = arith.extf %5 : vector<4x128xbf16> to vector<4x128xf32>
    %7 = arith.addf %3, %6 : vector<4x128xf32>
    %c1_8 = arith.constant 1 : index
    %c0_9 = arith.constant 0 : index
    %8 = vector.load %arg11[%c1_8, %c0_9] : memref<8x128xf32, #tpu.memory_space<vmem>>, vector<4x128xf32>
    tpu.vector_store %arg11[%c1_8, %c0_9], %7 {strides = array<i32>} : memref<8x128xf32, #tpu.memory_space<vmem>>, vector<4x128xf32>,
    %c0_10 = arith.constant 0 : index
    %c0_11 = arith.constant 0 : index
    %9 = vector.load %arg11[%c0_10, %c0_11] : memref<8x128xf32, #tpu.memory_space<vmem>>, vector<8x128xf32>
    %c0_12 = arith.constant 0 : index
    %c0_13 = arith.constant 0 : index
    %10 = vector.load %arg8[%c0_12, %c0_13] : memref<8x128xf32, #tpu.memory_space<vmem>>, vector<1x128xf32>
    %c1_14 = arith.constant 1 : index
    %c0_15 = arith.constant 0 : index
    %11 = vector.load %arg8[%c1_14, %c0_15] : memref<8x128xf32, #tpu.memory_space<vmem>>, vector<1x128xf32>
    %c2 = arith.constant 2 : index
    %c0_16 = arith.constant 0 : index
    %12 = vector.load %arg8[%c2, %c0_16] : memref<8x128xf32, #tpu.memory_space<vmem>>, vector<1x128xf32>
    %c3 = arith.constant 3 : index
    %c0_17 = arith.constant 0 : index
    %13 = vector.load %arg8[%c3, %c0_17] : memref<8x128xf32, #tpu.memory_space<vmem>>, vector<1x128xf32>
    %c4 = arith.constant 4 : index
    %c0_18 = arith.constant 0 : index
    %14 = vector.load %arg8[%c4, %c0_18] : memref<8x128xf32, #tpu.memory_space<vmem>>, vector<1x128xf32>
    %c5 = arith.constant 5 : index
    %c0_19 = arith.constant 0 : index
    %15 = vector.load %arg8[%c5, %c0_19] : memref<8x128xf32, #tpu.memory_space<vmem>>, vector<1x128xf32>
    %c6 = arith.constant 6 : index
    %c0_20 = arith.constant 0 : index
    %16 = vector.load %arg8[%c6, %c0_20] : memref<8x128xf32, #tpu.memory_space<vmem>>, vector<1x128xf32>
    %cst = arith.constant dense<0.000000e+00> : vector<8xf32>
    %17 = vector.multi_reduction <add>, %9, %cst [1] : vector<8x128xf32> to vector<8xf32>
    %18 = vector.shape_cast %17 : vector<8xf32> to vector<8x1xf32>
    %cst_21 = arith.constant 1.280000e+02 : f32
    %19 = vector.broadcast %cst_21 : f32 to vector<8x1xf32>
    %20 = arith.divf %18, %19 : vector<8x1xf32>
    %21 = vector.broadcast %20 : vector<8x1xf32> to vector<8x128xf32>
    %22 = arith.subf %9, %21 : vector<8x128xf32>
    %23 = arith.mulf %22, %22 : vector<8x128xf32>
    %cst_22 = arith.constant dense<0.000000e+00> : vector<8xf32>
    %24 = vector.multi_reduction <add>, %23, %cst_22 [1] : vector<8x128xf32> to vector<8xf32>
    %25 = vector.shape_cast %24 : vector<8xf32> to vector<8x1xf32>
    %cst_23 = arith.constant 1.280000e+02 : f32
    %26 = vector.broadcast %cst_23 : f32 to vector<8x1xf32>
    %27 = arith.divf %25, %26 : vector<8x1xf32>
    %28 = vector.broadcast %20 : vector<8x1xf32> to vector<8x128xf32>
    %29 = arith.subf %9, %28 : vector<8x128xf32>
    %cst_24 = arith.constant 9.99999974E-6 : f32
    %30 = vector.broadcast %cst_24 : f32 to vector<8x1xf32>
    %31 = arith.addf %27, %30 : vector<8x1xf32>
    %32 = math.rsqrt %31 : vector<8x1xf32>
    %33 = vector.broadcast %32 : vector<8x1xf32> to vector<8x128xf32>
    %34 = arith.mulf %29, %33 : vector<8x128xf32>
    %35 = vector.broadcast %10 : vector<1x128xf32> to vector<8x128xf32>
    %36 = arith.mulf %34, %35 : vector<8x128xf32>
    %37 = vector.broadcast %11 : vector<1x128xf32> to vector<8x128xf32>
    %38 = arith.addf %36, %37 : vector<8x128xf32>
    %39 = arith.truncf %38 : vector<8x128xf32> to vector<8x128xbf16>
    %c0_25 = arith.constant 0 : index
    %c0_26 = arith.constant 0 : index
    %40 = vector.load %arg3[%c0_25, %c0_26] : memref<128x384xbf16, #tpu.memory_space<vmem>>, vector<128x384xbf16>
    %cst_27 = arith.constant dense<0.000000e+00> : vector<8x384xf32>
    %41 = tpu.matmul %39, %40, %cst_27 {dimension_numbers = #tpu.dot_dimension_numbers<[1], [0], [0], [1], [0, 0, 1, 1], [], []>} : vector<8x128xbf16>, vector<128x384xbf16>, vector<8x384xf32> -> vector<8x384xf32>
    %42 = vector.extract_strided_slice %41 {offsets = [0, 0], sizes = [1, 128], strides = [1, 1]} : vector<8x384xf32> to vector<1x128xf32>
    %43 = arith.truncf %42 : vector<1x128xf32> to vector<1x128xbf16>
    %44 = vector.extract_strided_slice %41 {offsets = [0, 128], sizes = [8, 128], strides = [1, 1]} : vector<8x384xf32> to vector<8x128xf32>
    %45 = arith.truncf %44 : vector<8x128xf32> to vector<8x128xbf16>
    %46 = vector.extract_strided_slice %41 {offsets = [0, 256], sizes = [8, 128], strides = [1, 1]} : vector<8x384xf32> to vector<8x128xf32>
    %47 = arith.truncf %46 : vector<8x128xf32> to vector<8x128xbf16>
    %cst_28 = arith.constant dense<0.000000e+00> : vector<1x8xf32>
    %48 = tpu.matmul %43, %45, %cst_28 {dimension_numbers = #tpu.dot_dimension_numbers<[1], [1], [0], [0], [0, 0, 1, 0], [], []>} : vector<1x128xbf16>, vector<8x128xbf16>, vector<1x8xf32> -> vector<1x8xf32>
    %cst_29 = arith.constant 0.0883883461 : f32
    %49 = vector.broadcast %cst_29 : f32 to vector<1x8xf32>
    %50 = arith.mulf %48, %49 : vector<1x8xf32>
    %51 = tpu.iota {dimensions = array<i32: 1>} : vector<1x8xi32>
    %c5_i32 = arith.constant 5 : i32
    %52 = vector.broadcast %c5_i32 : i32 to vector<1x8xi32>
    %53 = arith.cmpi slt, %51, %52 : vector<1x8xi32>
    %cst_30 = arith.constant 0xFF800000 : f32
    %54 = vector.broadcast %cst_30 : f32 to vector<1x8xf32>
    %55 = arith.select %53, %50, %54 : vector<1x8xi1>, vector<1x8xf32>
    %cst_31 = arith.constant dense<0xFF800000> : vector<1xf32>
    %56 = vector.multi_reduction <maximumf>, %55, %cst_31 [1] : vector<1x8xf32> to vector<1xf32>
    %57 = vector.shape_cast %56 : vector<1xf32> to vector<1x1xf32>
    %58 = vector.broadcast %57 : vector<1x1xf32> to vector<1x8xf32>
    %59 = arith.subf %55, %58 : vector<1x8xf32>
    %60 = math.exp %59 : vector<1x8xf32>
    %cst_32 = arith.constant dense<0.000000e+00> : vector<1xf32>
    %61 = vector.multi_reduction <add>, %60, %cst_32 [1] : vector<1x8xf32> to vector<1xf32>
    %62 = vector.shape_cast %61 : vector<1xf32> to vector<1x1xf32>
    %63 = tpu.reciprocal %62 {approx = true} : vector<1x1xf32> -> vector<1x1xf32>
    %64 = vector.broadcast %63 : vector<1x1xf32> to vector<1x8xf32>
    %65 = arith.mulf %60, %64 : vector<1x8xf32>
    %66 = arith.truncf %65 : vector<1x8xf32> to vector<1x8xbf16>
    %cst_33 = arith.constant dense<0.000000e+00> : vector<1x128xf32>
    %67 = tpu.matmul %66, %47, %cst_33 {dimension_numbers = #tpu.dot_dimension_numbers<[1], [0], [0], [1], [0, 0, 1, 1], [], []>} : vector<1x8xbf16>, vector<8x128xbf16>, vector<1x128xf32> -> vector<1x128xf32>
    %68 = vector.extract_strided_slice %9 {offsets = [0, 0], sizes = [1, 128], strides = [1, 1]} : vector<8x128xf32> to vector<1x128xf32>
    %69 = arith.truncf %67 : vector<1x128xf32> to vector<1x128xbf16>
    %c0_34 = arith.constant 0 : index
    %c0_35 = arith.constant 0 : index
    %70 = vector.load %arg4[%c0_34, %c0_35] : memref<128x128xbf16, #tpu.memory_space<vmem>>, vector<128x128xbf16>
    %cst_36 = arith.constant dense<0.000000e+00> : vector<1x128xf32>
    %71 = tpu.matmul %69, %70, %cst_36 {dimension_numbers = #tpu.dot_dimension_numbers<[1], [0], [0], [1], [0, 0, 1, 1], [], []>} : vector<1x128xbf16>, vector<128x128xbf16>, vector<1x128xf32> -> vector<1x128xf32>
    %72 = arith.addf %68, %71 : vector<1x128xf32>
    %cst_37 = arith.constant dense<0.000000e+00> : vector<1xf32>
    %73 = vector.multi_reduction <add>, %72, %cst_37 [1] : vector<1x128xf32> to vector<1xf32>
    %74 = vector.shape_cast %73 : vector<1xf32> to vector<1x1xf32>
    %cst_38 = arith.constant 1.280000e+02 : f32
    %75 = vector.broadcast %cst_38 : f32 to vector<1x1xf32>
    %76 = arith.divf %74, %75 : vector<1x1xf32>
    %77 = vector.broadcast %76 : vector<1x1xf32> to vector<1x128xf32>
    %78 = arith.subf %72, %77 : vector<1x128xf32>
    %79 = arith.mulf %78, %78 : vector<1x128xf32>
    %cst_39 = arith.constant dense<0.000000e+00> : vector<1xf32>
    %80 = vector.multi_reduction <add>, %79, %cst_39 [1] : vector<1x128xf32> to vector<1xf32>
    %81 = vector.shape_cast %80 : vector<1xf32> to vector<1x1xf32>
    %cst_40 = arith.constant 1.280000e+02 : f32
    %82 = vector.broadcast %cst_40 : f32 to vector<1x1xf32>
    %83 = arith.divf %81, %82 : vector<1x1xf32>
    %84 = vector.broadcast %76 : vector<1x1xf32> to vector<1x128xf32>
    %85 = arith.subf %72, %84 : vector<1x128xf32>
    %cst_41 = arith.constant 9.99999974E-6 : f32
    %86 = vector.broadcast %cst_41 : f32 to vector<1x1xf32>
    %87 = arith.addf %83, %86 : vector<1x1xf32>
    %88 = math.rsqrt %87 : vector<1x1xf32>
    %89 = vector.broadcast %88 : vector<1x1xf32> to vector<1x128xf32>
    %90 = arith.mulf %85, %89 : vector<1x128xf32>
    %91 = arith.mulf %90, %12 : vector<1x128xf32>
    %92 = arith.addf %91, %13 : vector<1x128xf32>
    %93 = arith.truncf %92 : vector<1x128xf32> to vector<1x128xbf16>
    %c0_42 = arith.constant 0 : index
    %c0_43 = arith.constant 0 : index
    %94 = vector.load %arg5[%c0_42, %c0_43] : memref<128x512xbf16, #tpu.memory_space<vmem>>, vector<128x512xbf16>
    %cst_44 = arith.constant dense<0.000000e+00> : vector<1x512xf32>
    %95 = tpu.matmul %93, %94, %cst_44 {dimension_numbers = #tpu.dot_dimension_numbers<[1], [0], [0], [1], [0, 0, 1, 1], [], []>} : vector<1x128xbf16>, vector<128x512xbf16>, vector<1x512xf32> -> vector<1x512xf32>
    %c0_45 = arith.constant 0 : index
    %c0_46 = arith.constant 0 : index
    %96 = vector.load %arg6[%c0_45, %c0_46] : memref<1x512xf32, #tpu.memory_space<vmem>>, vector<1x512xf32>
    %97 = arith.addf %95, %96 : vector<1x512xf32>
    %98 = arith.mulf %97, %97 : vector<1x512xf32>
    %99 = arith.mulf %97, %98 : vector<1x512xf32>
    %cst_47 = arith.constant 4.471500e-02 : f32
    %100 = vector.broadcast %cst_47 : f32 to vector<1x512xf32>
    %101 = arith.mulf %100, %99 : vector<1x512xf32>
    %102 = arith.addf %97, %101 : vector<1x512xf32>
    %cst_48 = arith.constant 0.797884583 : f32
    %103 = vector.broadcast %cst_48 : f32 to vector<1x512xf32>
    %104 = arith.mulf %103, %102 : vector<1x512xf32>
    %105 = math.tanh %104 : vector<1x512xf32>
    %cst_49 = arith.constant 1.000000e+00 : f32
    %106 = vector.broadcast %cst_49 : f32 to vector<1x512xf32>
    %107 = arith.addf %106, %105 : vector<1x512xf32>
    %cst_50 = arith.constant 5.000000e-01 : f32
    %108 = vector.broadcast %cst_50 : f32 to vector<1x512xf32>
    %109 = arith.mulf %108, %107 : vector<1x512xf32>
    %110 = arith.mulf %97, %109 : vector<1x512xf32>
    %111 = arith.truncf %110 : vector<1x512xf32> to vector<1x512xbf16>
    %c0_51 = arith.constant 0 : index
    %c0_52 = arith.constant 0 : index
    %112 = vector.load %arg7[%c0_51, %c0_52] : memref<512x128xbf16, #tpu.memory_space<vmem>>, vector<512x128xbf16>
    %cst_53 = arith.constant dense<0.000000e+00> : vector<1x128xf32>
    %113 = tpu.matmul %111, %112, %cst_53 {dimension_numbers = #tpu.dot_dimension_numbers<[1], [0], [0], [1], [0, 0, 1, 1], [], []>} : vector<1x512xbf16>, vector<512x128xbf16>, vector<1x128xf32> -> vector<1x128xf32>
    %114 = arith.addf %72, %113 : vector<1x128xf32>
    %115 = arith.addf %114, %14 : vector<1x128xf32>
    %cst_54 = arith.constant dense<0.000000e+00> : vector<1xf32>
    %116 = vector.multi_reduction <add>, %115, %cst_54 [1] : vector<1x128xf32> to vector<1xf32>
    %117 = vector.shape_cast %116 : vector<1xf32> to vector<1x1xf32>
    %cst_55 = arith.constant 1.280000e+02 : f32
    %118 = vector.broadcast %cst_55 : f32 to vector<1x1xf32>
    %119 = arith.divf %117, %118 : vector<1x1xf32>
    %120 = vector.broadcast %119 : vector<1x1xf32> to vector<1x128xf32>
    %121 = arith.subf %115, %120 : vector<1x128xf32>
    %122 = arith.mulf %121, %121 : vector<1x128xf32>
    %cst_56 = arith.constant dense<0.000000e+00> : vector<1xf32>
    %123 = vector.multi_reduction <add>, %122, %cst_56 [1] : vector<1x128xf32> to vector<1xf32>
    %124 = vector.shape_cast %123 : vector<1xf32> to vector<1x1xf32>
    %cst_57 = arith.constant 1.280000e+02 : f32
    %125 = vector.broadcast %cst_57 : f32 to vector<1x1xf32>
    %126 = arith.divf %124, %125 : vector<1x1xf32>
    %127 = vector.broadcast %119 : vector<1x1xf32> to vector<1x128xf32>
    %128 = arith.subf %115, %127 : vector<1x128xf32>
    %cst_58 = arith.constant 9.99999974E-6 : f32
    %129 = vector.broadcast %cst_58 : f32 to vector<1x1xf32>
    %130 = arith.addf %126, %129 : vector<1x1xf32>
    %131 = math.rsqrt %130 : vector<1x1xf32>
    %132 = vector.broadcast %131 : vector<1x1xf32> to vector<1x128xf32>
    %133 = arith.mulf %128, %132 : vector<1x128xf32>
    %134 = arith.mulf %133, %15 : vector<1x128xf32>
    %135 = arith.addf %134, %16 : vector<1x128xf32>
    %136 = arith.mulf %135, %135 : vector<1x128xf32>
    %cst_59 = arith.constant dense<0.000000e+00> : vector<1xf32>
    %137 = vector.multi_reduction <add>, %136, %cst_59 [1] : vector<1x128xf32> to vector<1xf32>
    %138 = vector.shape_cast %137 : vector<1xf32> to vector<1x1xf32>
    %cst_60 = arith.constant 9.99999996E-13 : f32
    %139 = vector.broadcast %cst_60 : f32 to vector<1x1xf32>
    %140 = arith.addf %138, %139 : vector<1x1xf32>
    %141 = math.rsqrt %140 : vector<1x1xf32>
    %142 = vector.broadcast %141 : vector<1x1xf32> to vector<1x128xf32>
    %143 = arith.mulf %135, %142 : vector<1x128xf32>
    %144 = arith.truncf %143 : vector<1x128xf32> to vector<1x128xbf16>
    %c0_61 = arith.constant 0 : index
    %c0_62 = arith.constant 0 : index
    %145 = vector.load %arg9[%c0_61, %c0_62] : memref<128x128xbf16, #tpu.memory_space<vmem>>, vector<128x128xbf16>
    %cst_63 = arith.constant dense<0.000000e+00> : vector<1x128xf32>
    %146 = tpu.matmul %144, %145, %cst_63 {dimension_numbers = #tpu.dot_dimension_numbers<[1], [1], [0], [0], [0, 0, 1, 0], [], []>} : vector<1x128xbf16>, vector<128x128xbf16>, vector<1x128xf32> -> vector<1x128xf32>
    %cst_64 = arith.constant 1.000000e+02 : f32
    %147 = vector.broadcast %cst_64 : f32 to vector<1x128xf32>
    %148 = arith.mulf %147, %146 : vector<1x128xf32>
    %c0_65 = arith.constant 0 : index
    %c0_66 = arith.constant 0 : index
    %c0_67 = arith.constant 0 : index
    %149 = vector.load %arg10[%c0_65, %c0_66, %c0_67] : memref<1x1x128xf32, #tpu.memory_space<vmem>>, vector<1x1x128xf32>
    %150 = vector.shape_cast %149 : vector<1x1x128xf32> to vector<1x128xf32>
    %151 = vector.shape_cast %148 : vector<1x128xf32> to vector<1x1x128xf32>
    tpu.vector_store %arg10[%c0_65, %c0_66, %c0_67], %151 {strides = array<i32>} : memref<1x1x128xf32, #tpu.memory_space<vmem>>, vector<1x1x128xf32>,
    return
  }
  func.func @transform_0(%arg0: i32) -> (i32, i32, i32) {
    %c0_i32 = arith.constant 0 : i32
    %c0_i32_0 = arith.constant 0 : i32
    %c0_i32_1 = arith.constant 0 : i32
    return %arg0, %c0_i32, %c0_i32_0 : i32, i32, i32
  }
  func.func @transform_1(%arg0: i32) -> (i32, i32, i32) {
    %c0_i32 = arith.constant 0 : i32
    %c0_i32_0 = arith.constant 0 : i32
    %c0_i32_1 = arith.constant 0 : i32
    %c0_i32_2 = arith.constant 0 : i32
    return %c0_i32, %c0_i32_0, %c0_i32_1 : i32, i32, i32
  }
  func.func @transform_2(%arg0: i32) -> (i32, i32) {
    %c0_i32 = arith.constant 0 : i32
    %c0_i32_0 = arith.constant 0 : i32
    %c0_i32_1 = arith.constant 0 : i32
    return %c0_i32, %c0_i32_0 : i32, i32
  }
  func.func @transform_3(%arg0: i32) -> (i32, i32) {
    %c0_i32 = arith.constant 0 : i32
    %c0_i32_0 = arith.constant 0 : i32
    %c0_i32_1 = arith.constant 0 : i32
    return %c0_i32, %c0_i32_0 : i32, i32
  }
  func.func @transform_4(%arg0: i32) -> (i32, i32) {
    %c0_i32 = arith.constant 0 : i32
    %c0_i32_0 = arith.constant 0 : i32
    %c0_i32_1 = arith.constant 0 : i32
    return %c0_i32, %c0_i32_0 : i32, i32
  }
  func.func @transform_5(%arg0: i32) -> (i32, i32) {
    %c0_i32 = arith.constant 0 : i32
    %c0_i32_0 = arith.constant 0 : i32
    %c0_i32_1 = arith.constant 0 : i32
    return %c0_i32, %c0_i32_0 : i32, i32
  }
  func.func @transform_6(%arg0: i32) -> (i32, i32) {
    %c0_i32 = arith.constant 0 : i32
    %c0_i32_0 = arith.constant 0 : i32
    %c0_i32_1 = arith.constant 0 : i32
    return %c0_i32, %c0_i32_0 : i32, i32
  }
  func.func @transform_7(%arg0: i32) -> (i32, i32) {
    %c0_i32 = arith.constant 0 : i32
    %c0_i32_0 = arith.constant 0 : i32
    %c0_i32_1 = arith.constant 0 : i32
    return %c0_i32, %c0_i32_0 : i32, i32
  }
  func.func @transform_8(%arg0: i32) -> (i32, i32) {
    %c0_i32 = arith.constant 0 : i32
    %c0_i32_0 = arith.constant 0 : i32
    %c0_i32_1 = arith.constant 0 : i32
    return %c0_i32, %c0_i32_0 : i32, i32
  }
  func.func @transform_9(%arg0: i32) -> (i32, i32, i32) {
    %c0_i32 = arith.constant 0 : i32
    %c0_i32_0 = arith.constant 0 : i32
    %c0_i32_1 = arith.constant 0 : i32
    return %arg0, %c0_i32, %c0_i32_0 : i32, i32, i32
  }
}

</mosaic_0001>

<bundles_post_ra>
// kernel: flava_zero_shot_forward.2
= control target key start
LH: loop header
LB: loop body
LE: loop exit
PB: predicated region body
PF: predicated region fallthrough
CT: control target
= control target key end

     0   :  { %8 = vsyncpa [#allocation3], 0  ;;  %s341_s0 = inlined_call_operand.vmem [shape: bf16[8,192], index: 0, kind: input, shape index: {}]   ;;  %s342_s1 = inlined_call_operand.hbm [shape: bf16[192,128], index: 1, kind: input, shape index: {}]   ;;  %s343_s2 = inlined_call_operand.hbm [shape: f32[1,128], index: 2, kind: input, shape index: {}]   ;;  %s344_s3 = inlined_call_operand.vmem [shape: bf16[8,128], index: 3, kind: output, shape index: {}]  }
   0x1   :  { %9 = vsyncpa [#allocation5], 0  ;;  %s286_s12 = smov [#allocation2]   ;;  %s238_s16 = scalar_lea.hbm %s342_s1, 1536 }
   0x2   :  { %s17_s13 = sshll.u32 %s286_s12, 4  ;;  %p239_p0 = scmp.ne.s32.totalorder %s342_s1, %s238_s16  ;;  %s18_s13 = int_to_ptr.vmem [resolvable:$true] %s17_s13 }
   0x3   :  { %p242_p1 = scmp.lt.u32.totalorder %s238_s16, %s342_s1 }
   0x5   :  { %p244_p2 = pnand %p242_p1, %p239_p0 }
   0x7   :  { %247 = shalt.err (!%p244_p2)
}
   0x8   :  { %s248_s21 = scalar_lea.vmem %s18_s13, 1536  ;;  %p253_p4 = scmp.lt.s32.totalorder %s18_s13, %s18_s13 }
   0x9   :  { %p249_p3 = scmp.ne.s32.totalorder %s18_s13, %s248_s21  ;;  %p254_p5 = scmp.lt.s32.totalorder %s248_s21, %s248_s21 }
   0xb   :  { %p255_p6 = por %p254_p5, %p253_p4 }
   0xd   :  { %p256_p7 = pnand %p255_p6, %p249_p3 }
   0xf   :  { %259 = shalt.err (!%p256_p7)
}
  0x10   :  { %s287_s22 = smov 64   ;;  %s288_s23 = smov 4  }
  0x11   :  { %23 = dma.hbm_to_vmem [thread:$0]  %s342_s1, 1536, %s18_s13, [#allocation3], %s287_s22, %s287_s22, %s288_s23  }
  0x12   :  { %s289_s26 = smov [#allocation4]   ;;  %s260_s30 = scalar_lea.hbm %s343_s2, 16 }
  0x13   :  { %s30_s27 = sshll.u32 %s289_s26, 4  ;;  %p261_p8 = scmp.ne.s32.totalorder %s343_s2, %s260_s30  ;;  %s31_s27 = int_to_ptr.vmem [resolvable:$true] %s30_s27 }
  0x14   :  { %p264_p9 = scmp.lt.u32.totalorder %s260_s30, %s343_s2 }
  0x16   :  { %p266_p10 = pnand %p264_p9, %p261_p8 }
  0x18   :  { %269 = shalt.err (!%p266_p10)
}
  0x19   :  { %s270_s8 = scalar_lea.vmem %s31_s27, 16  ;;  %s274_s1 = scalar_lea.vmem %s31_s27, 32 }
  0x1a   :  { %p271_p11 = scmp.ne.s32.totalorder %s31_s27, %s270_s8  ;;  %p275_p12 = scmp.lt.s32.totalorder %s31_s27, %s31_s27 }
  0x1b   :  { %p276_p13 = scmp.lt.s32.totalorder %s274_s1, %s270_s8 }
  0x1d   :  { %p277_p0 = por %p276_p13, %p275_p12 }
  0x1f   :  { %p278_p1 = pnand %p277_p0, %p271_p11 }
  0x21   :  { %281 = shalt.err (!%p278_p1)
}
  0x22   :  { %33 = dma.hbm_to_vmem [thread:$0]  %s343_s2, 16, %s31_s27, [#allocation5]  }
  0x23   :  { %282 = dma.done.wait [#allocation3], 1536  }
  0x24   :  { %283 = vsyncadd [#allocation3], 4294965760 }
  0x25   :  { %284 = dma.done.wait [#allocation5], 16  }
  0x26   :  { %285 = vsyncadd [#allocation5], 4294967280  ;;  %v290_v0 = vmov 0   ;;  %v224_v1 = vld [vmem:[#allocation2] sm:$0xff]   ;;  %v225_v2 = vld [vmem:[#allocation2 + $0x8] sm:$0xff]   ;;  %vm151_vm0 = vcmask 523264  }
  0x27   :  { %155 = vmatprep.subr.bf16.mxu0 %v290_v0  ;;  %v226_v3 = vld [vmem:[#allocation2 + $0x10] sm:$0xff]   ;;  %v227_v4 = vld [vmem:[#allocation2 + $0x18] sm:$0xff]   ;;  %v41_v5 = vld [vmem:[%s341_s0] sm:$0xff] }
  0x28   :  { %156 = vmatpush1.bf16.msra.mxu0 %v224_v1  ;;  %v205_v6 = vcombine.high %v41_v5, %v41_v5  ;;  %v228_v7 = vld [vmem:[#allocation2 + $0x20] sm:$0xff]   ;;  %v229_v8 = vld [vmem:[#allocation2 + $0x28] sm:$0xff]   ;;  %v230_v9 = vld [vmem:[#allocation2 + $0x30] sm:$0xff]   ;;  %v204_v15 = vcombine.low %v41_v5, %v41_v5 }
  0x29   :  { %157 = vmatprep.subr.bf16.mxu0 %v290_v0  ;;  %v231_v10 = vld [vmem:[#allocation2 + $0x38] sm:$0xff]   ;;  %v232_v11 = vld [vmem:[#allocation2 + $0x40] sm:$0xff]   ;;  %v233_v12 = vld [vmem:[#allocation2 + $0x48] sm:$0xff]  }
  0x2a   :  { %218 = vmatprep.mubr.msk.bf16.mxu0 %vm151_vm0, %v205_v6  ;;  %v234_v13 = vld [vmem:[#allocation2 + $0x50] sm:$0xff]   ;;  %v235_v14 = vld [vmem:[#allocation2 + $0x58] sm:$0xff]   ;;  %v203_v16 = vld [vmem:[#allocation4] ss:$0 sm:$0xff] }
  0x2c   :  { %158 = vmatpush1.bf16.msra.mxu0 %v225_v2 }
  0x2d   :  { %159 = vmatprep.subr.bf16.mxu0 %v290_v0 }
  0x30   :  { %160 = vmatpush1.bf16.msra.mxu0 %v226_v3 }
  0x31   :  { %161 = vmatprep.subr.bf16.mxu0 %v290_v0 }
  0x34   :  { %162 = vmatpush1.bf16.msra.mxu0 %v227_v4 }
  0x35   :  { %163 = vmatprep.subr.bf16.mxu0 %v290_v0 }
  0x38   :  { %164 = vmatpush1.bf16.msra.mxu0 %v228_v7 }
  0x39   :  { %165 = vmatprep.subr.bf16.mxu0 %v290_v0 }
  0x3c   :  { %166 = vmatpush1.bf16.msra.mxu0 %v229_v8 }
  0x3d   :  { %167 = vmatprep.subr.bf16.mxu0 %v290_v0 }
  0x40   :  { %168 = vmatpush1.bf16.msra.mxu0 %v230_v9 }
  0x41   :  { %169 = vmatprep.subr.bf16.mxu0 %v290_v0 }
  0x44   :  { %170 = vmatpush1.bf16.msra.mxu0 %v231_v10 }
  0x45   :  { %171 = vmatprep.subr.bf16.mxu0 %v290_v0 }
  0x48   :  { %172 = vmatpush1.bf16.msra.mxu0 %v232_v11 }
  0x49   :  { %173 = vmatprep.subr.bf16.mxu0 %v290_v0 }
  0x4c   :  { %174 = vmatpush1.bf16.msra.mxu0 %v233_v12 }
  0x4d   :  { %175 = vmatprep.subr.bf16.mxu0 %v290_v0 }
  0x50   :  { %176 = vmatpush1.bf16.msra.mxu0 %v234_v13 }
  0x51   :  { %177 = vmatprep.subr.bf16.mxu0 %v290_v0 }
  0x54   :  { %178 = vmatpush1.bf16.msra.mxu0 %v235_v14 }
  0x57   :  { %188 = vmatmul.mubr.bf16.vlgmr.msra.gmra.mrb[0].mxu0 %v204_v15 }
 0x12a   :  { %v189_v17 = vpop.f32.mrb[0].mxu0 }
 0x12b   :  { %v190_v18 = vadd.f32 %v203_v16, %v189_v17  ;;  %v191_v19 = vpop.f32.mrb[1].mxu0 }
 0x12c   :  { %v192_v20 = vpop.f32.mrb[2].mxu0 }
 0x12d   :  { %v195_v21 = vpack.c.bf16 %v190_v18, %v190_v18  ;;  %v193_v22 = vpop.f32.mrb[3].mxu0 }
 0x12f   :  { %196 = vst [vmem:[%s344_s3] sm:$0xf] %v195_v21 }
 0x130   :  { %201 = vsyncpa [#allocation3], 1 }
 0x131   :  { %202 = vsyncpa [#allocation5], 1 }

// kernel: flava_zero_shot_forward.3
= control target key start
LH: loop header
LB: loop body
LE: loop exit
PB: predicated region body
PF: predicated region fallthrough
CT: control target
= control target key end

     0   :  { %14 = vsyncpa [#allocation4], 0  ;;  %s3185_s0 = inlined_call_operand.vmem [shape: bf16[2,4,128], index: 0, kind: input, shape index: {}]   ;;  %s3186_s1 = inlined_call_operand.hbm [shape: f32[1,8,128], index: 1, kind: input, shape index: {}]   ;;  %s3187_s2 = inlined_call_operand.vmem [shape: bf16[128,384], index: 2, kind: input, shape index: {}]   ;;  %s3188_s3 = inlined_call_operand.hbm [shape: bf16[128,128], index: 3, kind: input, shape index: {}]   ;;  %s3189_s4 = inlined_call_operand.vmem [shape: bf16[128,512], index: 4, kind: input, shape index: {}]   ;;  %s3190_s5 = inlined_call_operand.hbm [shape: f32[1,512], index: 5, kind: input, shape index: {}]   ;;  %s3191_s6 = inlined_call_operand.vmem [shape: bf16[512,128], index: 6, kind: input, shape index: {}]   ;;  %s3192_s7 = inlined_call_operand.hbm [shape: f32[8,128], index: 7, kind: input, shape index: {}]   ;;  %s3193_s8 = inlined_call_operand.hbm [shape: bf16[128,128], index: 8, kind: input, shape index: {}]   ;;  %s3194_s9 = inlined_call_operand.hbm [shape: f32[2,1,128], index: 9, kind: output, shape index: {}]  }
   0x1   :  { %15 = vsyncpa [#allocation7], 0 }
   0x2   :  { %16 = vsyncpa [#allocation10], 0 }
   0x3   :  { %17 = vsyncpa [#allocation5], 0 }
   0x4   :  { %19 = vsyncpa [#allocation5 + $0x1], 0  ;;  %s2619_s30 = smov 0   ;;  %s2621_s10 = smov 0  }
   0x5   :  { %s2623_s11 = smov 0   ;;  %s2625_s12 = smov 0  }
   0x6 LB: > { %3204 = sst [smem:[#allocation17_spill]] %s2544_s30  ;;  %s2640_s13 = sadd.s32 4294967295, %s2556_s12   ;;  %s2556_s12 = sphi %s2625_s12, %s3226_s12   ;;  %s2552_s11 = sphi %s2623_s11, %s3228_s11   ;;  %s2548_s10 = sphi %s2621_s10, %s3230_s10   ;;  %s2544_s30 = sphi %s2619_s30, %s3229_s30  }
   0x7   : > { %3205 = sst [smem:[#allocation18_spill]] %s2552_s11  ;;  %s1827_s14 = sadd.s32 4294967294, %s2556_s12  }
   0x8   : > { %s2644_s15 = sadd.s32 1, %s2556_s12   ;;  %s226_s16 = sadd.s32 1, %s2552_s11 }
   0x9   : > { %3206 = sst [smem:[#allocation19_spill]] %s2644_s15  ;;  %s223_s17 = ssub.s32 %s2556_s12, %s2644_s15 }
   0xa   : > { %p236_p0 = scmp.ne.s32.totalorder %s2552_s11, %s2548_s10  ;;  %p224_p1 = scmp.eq.s32.totalorder %s223_s17, 0 }
   0xb   : > { %p237_p2 = scmp.eq.s32.totalorder %s2640_s13, 1  ;;  %p242_p3 = scmp.ne.s32.totalorder %s2548_s10, %s2544_s30 }
   0xc   : > { %p243_p4 = scmp.eq.s32.totalorder %s1827_s14, 1  ;;  %p1828_p7 = scmp.ge.s32.totalorder %s2556_s12, 1 }
   0xd   : > { %s2655_s18 = scalar_select %p224_p1, %s2552_s11, %s226_s16  }
   0xe   : > { %p2657_p5 = por %p237_p2, %p236_p0  ;;  %p2661_p6 = por %p243_p4, %p242_p3 }
   0xf   : > { %3207 = sst [smem:[#allocation20_spill]] %s2655_s18  ;;  %p250_p8 = scmp.lt.s32.totalorder %s2556_s12, 3 }
  0x10   : > { %s3208_s19 = scalar_select %p2657_p5, 1, 0 }
  0x11   : > { %s3209_s20 = scalar_select %p2661_p6, 1, 0 }
  0x12   : > { %p3195_p9 = scmp.eq.s32.totalorder %s2640_s13, 0  ;;  %p2668_p10 = pnand %p1828_p7, %p250_p8 }
  0x13   : > { %3210 = sst [smem:[#allocation21_spill]] %s3209_s20  ;;  %s2558_s22 = smov [#allocation6]  }
  0x14   : > { %s3211_s21 = scalar_select %p2668_p10, 1, 0 }
  0x15   : > { %s276_s23 = sshll.u32 %s2558_s22, 4  ;;  %p2121_p11 = pneg %p2668_p10  ;;  %s2674_s23 = int_to_ptr.vmem [resolvable:$true] %s276_s23 }
  0x16   : > { %s2559_s25 = smov [#allocation9]   ;;  %s2560_s27 = smov [#allocation3]  }
  0x17   : > { %p2678_p12 = pnand %p3195_p9, %p2121_p11  ;;  %s307_s26 = sshll.u32 %s2559_s25, 4  ;;  %s2682_s26 = int_to_ptr.vmem [resolvable:$true] %s307_s26 }
  0x18   : > { %s2684_s28 = sshll.u32 %s2560_s27, 4  ;;  %s2342_s16 = scalar_lea.hbm %s3188_s3, 1024  ;;  %s264_s28 = int_to_ptr.vmem [resolvable:$true] %s2684_s28 }
  0x19   : > { %p2343_p13 = scmp.ne.s32.totalorder %s3188_s3, %s2342_s16  ;;  %p2694_p0 = pneg %p2678_p12 }
  0x1a   : > { %p2349_p3 = scmp.lt.u32.totalorder %s2342_s16, %s3188_s3 }
  0x1b   : > { %p2345_p1 = pnand %p2694_p0, %p2343_p13 }
  0x1d   : > { %p2346_p2 = pneg %p2345_p1 }
  0x1f   : > { %p2351_p4 = pnand %p2349_p3, %p2346_p2 }
  0x21   : > { %2354 = shalt.err (!%p2351_p4)
}
  0x22   : > { %s2355_s29 = scalar_lea.vmem %s2674_s23, 1024  ;;  %p2363_p9 = scmp.lt.s32.totalorder %s2674_s23, %s2674_s23 }
  0x23   : > { %p2356_p7 = scmp.ne.s32.totalorder %s2674_s23, %s2355_s29  ;;  %p2364_p6 = scmp.lt.s32.totalorder %s2355_s29, %s2355_s29 }
  0x25   : > { %p2358_p8 = pnand %p2356_p7, %p2694_p0  ;;  %p2365_p13 = por %p2364_p6, %p2363_p9 }
  0x27   : > { %p2359_p11 = pneg %p2358_p8 }
  0x29   : > { %p2366_p1 = pnand %p2365_p13, %p2359_p11 }
  0x2b   : > { %2369 = shalt.err (!%p2366_p1)
}
  0x2c   : > { %s3203_s14 = smov 64   ;;  %s2562_s16 = smov 4  }
  0x2d   : > { %2127 = dma.hbm_to_vmem [thread:$0]  (!%p2678_p12), %s3188_s3, 1024, %s2674_s23, [#allocation7], %s3203_s14, %s3203_s14, %s2562_s16  }
  0x2e   : > { %s2370_s29 = scalar_lea.hbm %s3192_s7, 128 }
  0x2f   : > { %p2371_p6 = scmp.ne.s32.totalorder %s3192_s7, %s2370_s29  ;;  %p2377_p3 = scmp.lt.u32.totalorder %s2370_s29, %s3192_s7 }
  0x31   : > { %p2373_p9 = pnand %p2371_p6, %p2694_p0 }
  0x33   : > { %p2374_p2 = pneg %p2373_p9 }
  0x35   : > { %p2379_p4 = pnand %p2377_p3, %p2374_p2 }
  0x37   : > { %2382 = shalt.err (!%p2379_p4)
}
  0x38   : > { %s2383_s23 = scalar_lea.vmem %s2682_s26, 128  ;;  %p2391_p13 = scmp.lt.s32.totalorder %s2682_s26, %s2682_s26 }
  0x39   : > { %p2384_p7 = scmp.ne.s32.totalorder %s2682_s26, %s2383_s23  ;;  %p2392_p1 = scmp.lt.s32.totalorder %s2383_s23, %s2383_s23 }
  0x3b   : > { %p2386_p8 = pnand %p2384_p7, %p2694_p0  ;;  %p2393_p6 = por %p2392_p1, %p2391_p13 }
  0x3d   : > { %p2387_p11 = pneg %p2386_p8 }
  0x3f   : > { %p2394_p9 = pnand %p2393_p6, %p2387_p11 }
  0x41   : > { %2397 = shalt.err (!%p2394_p9)
}
  0x42   : > { %2133 = dma.hbm_to_vmem [thread:$0]  (!%p2678_p12), %s3192_s7, 128, %s2682_s26, [#allocation10]  }
  0x43   : > { %s2398_s17 = scalar_lea.hbm %s3186_s1, 128 }
  0x44   : > { %p2399_p2 = scmp.ne.s32.totalorder %s3186_s1, %s2398_s17  ;;  %p2405_p7 = scmp.lt.u32.totalorder %s2398_s17, %s3186_s1 }
  0x46   : > { %p2401_p3 = pnand %p2399_p2, %p2694_p0 }
  0x48   : > { %p2402_p4 = pneg %p2401_p3 }
  0x4a   : > { %p2407_p8 = pnand %p2405_p7, %p2402_p4 }
  0x4c   : > { %2410 = shalt.err (!%p2407_p8)
}
  0x4d   : > { %s2411_s23 = scalar_lea.vmem %s264_s28, 128  ;;  %p2419_p6 = scmp.lt.s32.totalorder %s264_s28, %s264_s28 }
  0x4e   : > { %p2412_p11 = scmp.ne.s32.totalorder %s264_s28, %s2411_s23  ;;  %p2420_p9 = scmp.lt.s32.totalorder %s2411_s23, %s2411_s23 }
  0x50   : > { %p2414_p13 = pnand %p2412_p11, %p2694_p0  ;;  %p2421_p5 = por %p2420_p9, %p2419_p6 }
  0x52   : > { %p2415_p1 = pneg %p2414_p13 }
  0x54   : > { %p2422_p10 = pnand %p2421_p5, %p2415_p1 }
  0x56   : > { %2425 = shalt.err (!%p2422_p10)
}
  0x57   : > { %2124 = dma.hbm_to_vmem [thread:$0]  (!%p2678_p12), %s3186_s1, 128, %s264_s28, [#allocation4]  }
  0x58   : > { %s2563_s11 = smov [#allocation8]   ;;  %s2564_s20 = smov [#allocation11]  }
  0x59   : > { %s293_s15 = sshll.u32 %s2563_s11, 4  ;;  %s317_s17 = sshll.u32 %s2564_s20, 4  ;;  %s294_s15 = int_to_ptr.vmem [resolvable:$true] %s293_s15  ;;  %s318_s17 = int_to_ptr.vmem [resolvable:$true] %s317_s17 }
  0x5a   : > { %s2426_s27 = scalar_lea.hbm %s3190_s5, 64 }
  0x5b   : > { %p2427_p5 = scmp.ne.s32.totalorder %s3190_s5, %s2426_s27  ;;  %p2433_p3 = scmp.lt.u32.totalorder %s2426_s27, %s3190_s5 }
  0x5d   : > { %p2429_p10 = pnand %p2427_p5, %p2694_p0 }
  0x5f   : > { %p2430_p2 = pneg %p2429_p10 }
  0x61   : > { %p2435_p4 = pnand %p2433_p3, %p2430_p2 }
  0x63   : > { %2438 = shalt.err (!%p2435_p4)
}
  0x64   : > { %s2439_s28 = scalar_lea.vmem %s294_s15, 64  ;;  %p2447_p13 = scmp.lt.s32.totalorder %s294_s15, %s294_s15 }
  0x65   : > { %p2440_p7 = scmp.ne.s32.totalorder %s294_s15, %s2439_s28  ;;  %p2448_p1 = scmp.lt.s32.totalorder %s2439_s28, %s2439_s28 }
  0x67   : > { %p2442_p8 = pnand %p2440_p7, %p2694_p0  ;;  %p2449_p6 = por %p2448_p1, %p2447_p13 }
  0x69   : > { %p2443_p11 = pneg %p2442_p8 }
  0x6b   : > { %p2450_p9 = pnand %p2449_p6, %p2443_p11 }
  0x6d   : > { %2453 = shalt.err (!%p2450_p9)
}
  0x6e   : > { %2130 = dma.hbm_to_vmem [thread:$0]  (!%p2678_p12), %s3190_s5, 64, %s294_s15, [#allocation7]  }
  0x6f   : > { %s2454_s22 = scalar_lea.hbm %s3193_s8, 1024 }
  0x70   : > { %p2455_p5 = scmp.ne.s32.totalorder %s3193_s8, %s2454_s22  ;;  %p2461_p3 = scmp.lt.u32.totalorder %s2454_s22, %s3193_s8 }
  0x72   : > { %p2457_p10 = pnand %p2455_p5, %p2694_p0 }
  0x74   : > { %p2458_p2 = pneg %p2457_p10 }
  0x76   : > { %p2463_p4 = pnand %p2461_p3, %p2458_p2 }
  0x78   : > { %2466 = shalt.err (!%p2463_p4)
}
  0x79   : > { %s2467_s26 = scalar_lea.vmem %s318_s17, 1024  ;;  %p2475_p13 = scmp.lt.s32.totalorder %s318_s17, %s318_s17 }
  0x7a   : > { %p2468_p7 = scmp.ne.s32.totalorder %s318_s17, %s2467_s26  ;;  %p2476_p1 = scmp.lt.s32.totalorder %s2467_s26, %s2467_s26 }
  0x7c   : > { %p2470_p8 = pnand %p2468_p7, %p2694_p0  ;;  %p2477_p6 = por %p2476_p1, %p2475_p13 }
  0x7e   : > { %p2471_p11 = pneg %p2470_p8 }
  0x80   : > { %p2478_p9 = pnand %p2477_p6, %p2471_p11 }
  0x82   : > { %2481 = shalt.err (!%p2478_p9)
}
  0x83   : > { %s3214_s15 = smov 64   ;;  %p3215_p5 = scmp.ne.s32.totalorder %s3211_s21, 0 }
  0x84   : > { %2136 = dma.hbm_to_vmem [thread:$0]  (!%p2678_p12), %s3193_s8, 1024, %s318_s17, [#allocation10], %s3214_s15, %s3214_s15, %s2562_s16  }
  0x85   : > { %340 = sbr.rel (%p3215_p5) target bundleno = 3146 (0xc4a), region = 56  ;;  %p3216_p0 = scmp.eq.s32.totalorder (!%p3215_p5), %s2640_s13, 0 }
  0x8c   : > { %2527 = dma.done.wait (%p3216_p0), [#allocation4], 128   ;;  %p3217_p10 = pmov %p3216_p0 }
  0x8d   : > { %p3218_p2 = pmov %p3216_p0 }
  0x8e   : > { %2529 = vsyncadd (%p3217_p10), [#allocation4], 4294967168 }
  0x8f   : > { %2531 = dma.done.wait (%p3218_p2), [#allocation7], 1088   ;;  %p3219_p3 = pmov %p3216_p0 }
  0x90   : > { %p3220_p4 = pmov %p3216_p0 }
  0x91   : > { %2533 = vsyncadd (%p3219_p3), [#allocation7], 4294966208 }
  0x92   : > { %2535 = dma.done.wait (%p3220_p4), [#allocation10], 1152   ;;  %p3221_p12 = pmov %p3216_p0 }
  0x93   : > { %p390_p7 = scmp.lt.s32.totalorder %s2640_s13, 1  ;;  %v395_v0 = vld [vmem:[#allocation3] sm:$0xff]  ;;  %v2194_v6 = vld [vmem:[%s3187_s2 + $0x4] ss:$12 sps:$4 sm:$0xff]   ;;  %v2565_v8 = vmov 0.0   ;;  %v2566_v30 = vmov 0   ;;  %v718_v58 = vlaneseq }
  0x94   : > { %2537 = vsyncadd (%p3221_p12), [#allocation10], 4294966144  ;;  %396 = vst [vmem:[#allocation2] sm:$0xff] %v395_v0  ;;  %v2196_v7 = vld [vmem:[%s3187_s2] ss:$12 sps:$4 sm:$0xff]   ;;  %2027 = vmatprep.subr.bf16.mxu1 %v2565_v8  ;;  %593 = vmatprep.subr.bf16.mxu0 %v2194_v6  ;;  %vm2567_vm0 = vmmov 0  }
  0x95   : > { %s391_s18 = scalar_select %p390_p7, %s2640_s13, 1  ;;  %v2197_v9 = vld [vmem:[%s3187_s2 + $0x8] ss:$12 sps:$4 sm:$0xff]   ;;  %v2200_v11 = vld [vmem:[%s3187_s2 + $0x18] ss:$12 sps:$4 sm:$0xff]   ;;  %594 = vmatpush1.bf16.msra.mxu0 %v2196_v7  ;;  %625 = vmatprep.mubr.bf16.mxu0 %v2566_v30  ;;  %vm739_vm1 = vcmask 1043456  }
  0x96   : > { %v2198_v10 = vld [vmem:[%s3187_s2 + $0x1c] ss:$12 sps:$4 sm:$0xff]   ;;  %v2201_v12 = vld [vmem:[%s3187_s2 + $0x20] ss:$12 sps:$4 sm:$0xff]   ;;  %2028 = vmatpush3.bf16.msra.mxu1 %v2197_v9  ;;  %v2205_v19 = vld [vmem:[%s3187_s2 + $0x38] ss:$12 sps:$4 sm:$0xff]   ;;  %2043 = vmatprep.mubr.msk.bf16.mxu1 %vm2567_vm0, %v2565_v8 }
  0x97   : > { %s1841_s21 = sshll.u32 %s391_s18, 1  ;;  %v2202_v13 = vld [vmem:[%s3187_s2 + $0x34] ss:$12 sps:$4 sm:$0xff]   ;;  %595 = vmatprep.subr.bf16.mxu0 %v2198_v10  ;;  %2029 = vmatprep.subr.bf16.mxu1 %v2565_v8  ;;  %v2204_v18 = vld [vmem:[%s3187_s2 + $0x30] ss:$12 sps:$4 sm:$0xff]   ;;  %v719_v59 = vand.u32 127, %v718_v58 }
  0x98   : > { %s393_s17 = scalar_lea.vmem %s3185_s0, %s1841_s21  ;;  %v2206_v20 = vld [vmem:[%s3187_s2 + $0x4c] ss:$12 sps:$4 sm:$0xff]   ;;  %v2208_v21 = vld [vmem:[%s3187_s2 + $0x48] ss:$12 sps:$4 sm:$0xff]   ;;  %v2209_v22 = vld [vmem:[%s3187_s2 + $0x50] ss:$12 sps:$4 sm:$0xff]  }
  0x99   : > { %v398_v1 = vld [vmem:[%s393_s17] sm:$0x3]  ;;  %596 = vmatpush1.bf16.msra.mxu0 %v2200_v11  ;;  %v2210_v23 = vld [vmem:[%s3187_s2 + $0x64] ss:$12 sps:$4 sm:$0xff]   ;;  %v2213_v25 = vld [vmem:[%s3187_s2 + $0x68] ss:$12 sps:$4 sm:$0xff]  }
  0x9a   : > { %v399_v2 = vunpack.c.l.bf16 %v398_v1  ;;  %2030 = vmatpush3.bf16.msra.mxu1 %v2201_v12  ;;  %597 = vmatprep.subr.bf16.mxu0 %v2202_v13  ;;  %v2212_v24 = vld [vmem:[%s3187_s2 + $0x60] ss:$12 sps:$4 sm:$0xff]   ;;  %v2214_v26 = vld [vmem:[%s3187_s2 + $0x7c] ss:$12 sps:$4 sm:$0xff]   ;;  %v2216_v27 = vld [vmem:[%s3187_s2 + $0x78] ss:$12 sps:$4 sm:$0xff]  }
  0x9b   : > { %v397_v3 = vld [vmem:[#allocation2 + $0x1] sm:$0xf]  ;;  %2031 = vmatprep.subr.bf16.mxu1 %v2565_v8  ;;  %v2220_v31 = vld [vmem:[%s3187_s2 + $0x90] ss:$12 sps:$4 sm:$0xff]   ;;  %v2222_v33 = vld [vmem:[%s3187_s2 + $0xac] ss:$12 sps:$4 sm:$0xff]  }
  0x9c   : > { %v400_v4 = vadd.f32 %v399_v2, %v397_v3  ;;  %v2217_v28 = vld [vmem:[%s3187_s2 + $0x80] ss:$12 sps:$4 sm:$0xff]   ;;  %v2221_v32 = vld [vmem:[%s3187_s2 + $0x98] ss:$12 sps:$4 sm:$0xff]   ;;  %v2224_v34 = vld [vmem:[%s3187_s2 + $0xa8] ss:$12 sps:$4 sm:$0xff]  }
  0x9d   : > { %598 = vmatpush1.bf16.msra.mxu0 %v2204_v18  ;;  %v2218_v29 = vld [vmem:[%s3187_s2 + $0x94] ss:$12 sps:$4 sm:$0xff]   ;;  %v2225_v35 = vld [vmem:[%s3187_s2 + $0xb0] ss:$12 sps:$4 sm:$0xff]   ;;  %vm720_vm2 = vcmp.lt.s32.totalorder %v719_v59, 5  ;;  %vm722_vm3 = vcmask 57344  }
  0x9e   : > { %401 = vst [vmem:[#allocation2 + $0x1] sm:$0xf] %v400_v4  ;;  %2032 = vmatpush3.bf16.msra.mxu1 %v2205_v19  ;;  %599 = vmatprep.subr.bf16.mxu0 %v2206_v20  ;;  %v1842_v40 = vld [vmem:[#allocation9] ss:$0 sm:$0xff]  ;;  %v1843_v42 = vld [vmem:[#allocation9 + $0x1] ss:$0 sm:$0xff] }
  0x9f   : > { %2033 = vmatprep.subr.bf16.mxu1 %v2565_v8  ;;  %vm735_vm4 = vcmask 64512   ;;  %v2226_v13 = vld [vmem:[#allocation6] sm:$0xff]   ;;  %v2231_v19 = vld [vmem:[#allocation6 + $0x28] sm:$0xff]   ;;  %v2232_v20 = vld [vmem:[#allocation6 + $0x30] sm:$0xff]   ;;  %vm889_vm5 = vcmask 1040384   ;;  %s388_s29 = sand.u32 1, %s2548_s10  }
  0xa0   : > { %v2230_v18 = vld [vmem:[#allocation6 + $0x20] sm:$0xff]   ;;  %v2269_v59 = vld [vmem:[%s3189_s4 + $0xac] ss:$16 sps:$4 sm:$0xff]   ;;  %s1949_s23 = sshll.u32 %s2640_s13, 4  ;;  %s389_s26 = scalar_lea.vmem [#allocation12], %s388_s29 }
  0xa1   : > { %600 = vmatpush1.bf16.msra.mxu0 %v2208_v21  ;;  %v2233_v21 = vld [vmem:[#allocation6 + $0x38] sm:$0xff]   ;;  %s1722_s15 = sshll.u32 %s389_s26, 4  ;;  %s3143_s18 = scalar_lea.hbm %s3194_s9, %s1949_s23  ;;  %s3145_s15 = int_to_ptr.vmem [resolvable:$true] %s1722_s15 }
  0xa2   : > { %2034 = vmatpush3.bf16.msra.mxu1 %v2209_v22  ;;  %601 = vmatprep.subr.bf16.mxu0 %v2210_v23  ;;  %s1710_s21 = scalar_lea.sflag [#allocation5], %s388_s29  ;;  %s2482_s13 = scalar_lea.vmem %s3145_s15, 16 }
  0xa3   : > { %2035 = vmatprep.subr.bf16.mxu1 %v2565_v8  ;;  %p2483_p8 = scmp.ne.s32.totalorder %s3145_s15, %s2482_s13  ;;  %p3222_p11 = scmp.ne.s32.totalorder %s3208_s19, 0 }
  0xa4   : > { %s2568_s24 = smov [#allocation12]  }
  0xa5   : > { %v2818_v5 = vld [vmem:[#allocation2] sm:$0xff]  ;;  %602 = vmatpush1.bf16.msra.mxu0 %v2212_v24  ;;  %p2484_p13 = pnand %p2483_p8, %p3222_p11  ;;  %s2486_s16 = sshll.u32 %s2568_s24, 4  ;;  %s2487_s16 = int_to_ptr.vmem [resolvable:$false] %s2486_s16 }
  0xa6   : > { %410 = vadd.xlane.f32.xlu0 %v2818_v5  ;;  %2036 = vmatpush3.bf16.msra.mxu1 %v2213_v25  ;;  %s2488_s17 = scalar_lea.vmem %s2487_s16, 32  ;;  %p2489_p6 = scmp.lt.s32.totalorder %s3145_s15, %s2487_s16 }
  0xa7   : > { %603 = vmatprep.subr.bf16.mxu0 %v2214_v26  ;;  %2037 = vmatprep.subr.bf16.mxu1 %v2565_v8  ;;  %p2485_p1 = pneg %p2484_p13  ;;  %p2490_p9 = scmp.lt.s32.totalorder %s2488_s17, %s2482_s13 }
  0xa9   : > { %604 = vmatpush1.bf16.msra.mxu0 %v2216_v27  ;;  %p2491_p5 = por %p2490_p9, %p2489_p6 }
  0xaa   : > { %2038 = vmatpush3.bf16.msra.mxu1 %v2217_v28  ;;  %605 = vmatprep.subr.bf16.mxu0 %v2218_v29 }
  0xab   : > { %2039 = vmatprep.subr.bf16.mxu1 %v2565_v8  ;;  %p2492_p0 = pnand %p2491_p5, %p2485_p1 }
  0xad   : > { %606 = vmatpush1.bf16.msra.mxu0 %v2220_v31 }
  0xae   : > { %2040 = vmatpush3.bf16.msra.mxu1 %v2221_v32  ;;  %607 = vmatprep.subr.bf16.mxu0 %v2222_v33 }
  0xaf   : > { %2041 = vmatprep.subr.bf16.mxu1 %v2565_v8 }
  0xb1   : > { %608 = vmatpush1.bf16.msra.mxu0 %v2224_v34  ;;  %v2234_v34 = vld [vmem:[%s3189_s4] ss:$16 sps:$4 sm:$0xff]  }
  0xb2   : > { %2042 = vmatpush3.bf16.msra.mxu1 %v2225_v35  ;;  %2047 = vmatprep.subr.bf16.mxu0 %v2565_v8  ;;  %v2239_v35 = vld [vmem:[%s3189_s4 + $0xc] ss:$16 sps:$4 sm:$0xff]  }
 0x133   : > { %v411_v14 = vpop.xlane.xlu0 %410 }
 0x134   : > { %v413_v15 = vmul.f32 0.0078125, %v411_v14 }
 0x136   : > { %v414_v16 = vsub.f32 %v2818_v5, %v413_v15  ;;  %v2227_v15 = vld [vmem:[#allocation6 + $0x8] sm:$0xff]  }
 0x138   : > { %v415_v17 = vmul.f32 %v414_v16, %v414_v16 }
 0x13a   : > { %416 = vadd.xlane.f32.xlu0 %v415_v17  ;;  %v2229_v17 = vld [vmem:[#allocation6 + $0x18] sm:$0xff]  }
 0x1c7   : > { %v417_v36 = vpop.xlane.xlu0 %416 }
 0x1c8   : > { %v418_v37 = vmul.f32 0.0078125, %v417_v36  ;;  %v2242_v36 = vld [vmem:[%s3189_s4 + $0x24] ss:$16 sps:$4 sm:$0xff]  }
 0x1ca   : > { %v419_v38 = vadd.f32 1e-05, %v418_v37  ;;  %v2245_v37 = vld [vmem:[%s3189_s4 + $0x2c] ss:$16 sps:$4 sm:$0xff]  }
 0x1cc   : > { %2322 = vrsqrt.f32 %v419_v38  ;;  %v2240_v38 = vld [vmem:[%s3189_s4 + $0x20] ss:$16 sps:$4 sm:$0xff]  }
 0x1d6   : > { %v2323_v39 = vpop.eup %2322 }
 0x1d7   : > { %v421_v41 = vmul.f32 %v2323_v39, %v414_v16  ;;  %v2228_v16 = vld [vmem:[#allocation6 + $0x10] sm:$0xff]   ;;  %v2243_v39 = vld [vmem:[%s3189_s4 + $0x28] ss:$16 sps:$4 sm:$0xff]  }
 0x1d9   : > { %v426_v43 = vmul.f32 %v1842_v40, %v421_v41  ;;  %v2248_v40 = vld [vmem:[%s3189_s4 + $0x44] ss:$16 sps:$4 sm:$0xff]   ;;  %v2251_v41 = vld [vmem:[%s3189_s4 + $0x4c] ss:$16 sps:$4 sm:$0xff]  }
 0x1db   : > { %v431_v44 = vadd.f32 %v1843_v42, %v426_v43  ;;  %v2246_v42 = vld [vmem:[%s3189_s4 + $0x40] ss:$16 sps:$4 sm:$0xff]   ;;  %v2249_v43 = vld [vmem:[%s3189_s4 + $0x48] ss:$16 sps:$4 sm:$0xff]  }
 0x1dd   : > { %v432_v45 = vpack.c.bf16 %v431_v44, %v431_v44 }
 0x1df   : > { %626 = vmatmul.mubr.bf16.vlgmr.msra.gmra.mrb[0].mxu0 %v432_v45  ;;  %2044 = vmatmul.mubr.bf16.vlgmr.msra.gmra.mrb[0].mxu1 %v432_v45 }
 0x1e0   : > { %2049 = vmatprep.mubr.msk.bf16.mxu0 %vm2567_vm0, %v2565_v8  ;;  %1152 = vmatprep.mubr.bf16.mxu1 %v2566_v30 }
 0x2b2   : > { %v627_v46 = vpop.f32.mrb[0].mxu0  ;;  %v668_v47 = vpop.f32.mrb[0].mxu1 }
 0x2b3   : > { %v629_v48 = vpop.f32.mrb[1].mxu0  ;;  %v2045_v49 = vpop.f32.mrb[1].mxu1  ;;  %v676_v55 = vpack.c.bf16 %v668_v47, %v668_v47  ;;  %v674_v56 = vpack.c.bf16 %v627_v46, %v627_v46 }
 0x2b4   : > { %v675_v50 = vpack.c.bf16 %v629_v48, %v629_v48  ;;  %v631_v51 = vpop.f32.mrb[2].mxu0  ;;  %v671_v52 = vpop.f32.mrb[2].mxu1  ;;  %v2254_v49 = vld [vmem:[%s3189_s4 + $0x64] ss:$16 sps:$4 sm:$0xff]  }
 0x2b5   : > { %v632_v53 = vpop.f32.mrb[3].mxu0  ;;  %v2046_v54 = vpop.f32.mrb[3].mxu1  ;;  %v741_v57 = vsel %vm739_vm1, %v676_v55, 0  ;;  %v2252_v51 = vld [vmem:[%s3189_s4 + $0x60] ss:$16 sps:$4 sm:$0xff]  }
 0x2b6   : > { %2048 = vmatpush3.bf16.xpose.msra.mxu0 %v675_v50  ;;  %v2257_v50 = vld [vmem:[%s3189_s4 + $0x6c] ss:$16 sps:$4 sm:$0xff]   ;;  %v2255_v52 = vld [vmem:[%s3189_s4 + $0x68] ss:$16 sps:$4 sm:$0xff]   ;;  %v2258_v53 = vld [vmem:[%s3189_s4 + $0x80] ss:$16 sps:$4 sm:$0xff]  }
 0x2b7   : > { %2053 = vmatprep.subr.bf16.mxu0 %v2565_v8  ;;  %v2260_v54 = vld [vmem:[%s3189_s4 + $0x84] ss:$16 sps:$4 sm:$0xff]   ;;  %v2261_v55 = vld [vmem:[%s3189_s4 + $0x88] ss:$16 sps:$4 sm:$0xff]  }
 0x2bd   : > { %2050 = vmatmul.mubr.bf16.vlgmr.msra.gmra.mrb[4].mxu0 %v674_v56  ;;  %v2263_v56 = vld [vmem:[%s3189_s4 + $0x8c] ss:$16 sps:$4 sm:$0xff]  }
 0x2be   : > { %2054 = vmatpush3.bf16.msra.mxu0 %v741_v57  ;;  %2055 = vmatprep.mubr.msk.bf16.mxu0 %vm2567_vm0, %v2565_v8  ;;  %v2266_v57 = vld [vmem:[%s3189_s4 + $0xa4] ss:$16 sps:$4 sm:$0xff]  }
 0x2bf   : > { %2059 = vmatprep.subr.bf16.mxu0 %v2565_v8 }
 0x390   : > { %v711_v60 = vpop.f32.mrb[4].mxu0 }
 0x391   : > { %v717_v61 = vmul.f32 0.088388346, %v711_v60  ;;  %v2051_v62 = vpop.f32.mrb[5].mxu0  ;;  %v2264_v60 = vld [vmem:[%s3189_s4 + $0xa0] ss:$16 sps:$4 sm:$0xff]  }
 0x392   : > { %v714_v63 = vpop.f32.mrb[6].mxu0  ;;  %v2272_v62 = vld [vmem:[%s3189_s4 + $0xc4] ss:$16 sps:$4 sm:$0xff]  }
 0x393   : > { %v2052_v0 = vpop.f32.mrb[7].mxu0  ;;  %v721_v1 = vsel %vm720_vm2, %v717_v61, -inf  ;;  %v2267_v61 = vld [vmem:[%s3189_s4 + $0xa8] ss:$16 sps:$4 sm:$0xff]   ;;  %v2275_v63 = vld [vmem:[%s3189_s4 + $0xcc] ss:$16 sps:$4 sm:$0xff]  }
 0x394   : > { %v723_v2 = vsel %vm722_vm3, %v721_v1, -inf  ;;  %v2270_v0 = vld [vmem:[%s3189_s4 + $0xc0] ss:$16 sps:$4 sm:$0xff]  }
 0x395   : > { %724 = vmax.xlane.f32.xlu1 %v723_v2  ;;  %v2278_v2 = vld [vmem:[%s3189_s4 + $0xe4] ss:$16 sps:$4 sm:$0xff]  }
 0x422   : > { %v725_v3 = vpop.xlane.xlu1 %724 }
 0x423   : > { %v726_v4 = vsub.f32 %v721_v1, %v725_v3  ;;  %v2273_v1 = vld [vmem:[%s3189_s4 + $0xc8] ss:$16 sps:$4 sm:$0xff]   ;;  %v2281_v3 = vld [vmem:[%s3189_s4 + $0xec] ss:$16 sps:$4 sm:$0xff]  }
 0x425   : > { %v727_v6 = vmul.f32 1.442695, %v726_v4  ;;  %v2276_v4 = vld [vmem:[%s3189_s4 + $0xe0] ss:$16 sps:$4 sm:$0xff]  }
 0x427   : > { %2324 = vpow2.f32 %v727_v6  ;;  %v2279_v6 = vld [vmem:[%s3189_s4 + $0xe8] ss:$16 sps:$4 sm:$0xff]  }
 0x431   : > { %v2325_v7 = vpop.eup %2324 }
 0x432   : > { %v729_v9 = vsel %vm722_vm3, %v2325_v7, 0.0 }
 0x433   : > { %730 = vadd.xlane.f32.xlu1 %v729_v9 }
 0x4c0   : > { %v731_v10 = vpop.xlane.xlu1 %730 }
 0x4c1   : > { %2326 = vrcp.f32 %v731_v10 }
 0x4cb   : > { %v2327_v11 = vpop.eup %2326 }
 0x4cc   : > { %v733_v12 = vmul.f32 %v2327_v11, %v2325_v7 }
 0x4ce   : > { %v734_v14 = vpack.c.bf16 %v733_v12, %v733_v12  ;;  %v405_v12 = vld [vmem:[#allocation9 + $0x2] sm:$0x1] }
 0x4d0   : > { %2056 = vmatmul.mubr.msk.bf16.vlgmr.msra.gmra.mrb[8].mxu0 %vm735_vm4, %v734_v14  ;;  %v406_v14 = vld [vmem:[#allocation9 + $0x3] sm:$0x1] }
 0x4d1   : > { %2060 = vmatpush3.bf16.msra.mxu0 %v2226_v13  ;;  %2075 = vmatprep.mubr.msk.bf16.mxu0 %vm2567_vm0, %v2565_v8 }
 0x4d2   : > { %2061 = vmatprep.subr.bf16.mxu0 %v2565_v8 }
 0x4d5   : > { %2062 = vmatpush3.bf16.msra.mxu0 %v2227_v15 }
 0x4d6   : > { %2063 = vmatprep.subr.bf16.mxu0 %v2565_v8 }
 0x4d9   : > { %2064 = vmatpush3.bf16.msra.mxu0 %v2228_v16 }
 0x4da   : > { %2065 = vmatprep.subr.bf16.mxu0 %v2565_v8 }
 0x4dd   : > { %2066 = vmatpush3.bf16.msra.mxu0 %v2229_v17 }
 0x4de   : > { %2067 = vmatprep.subr.bf16.mxu0 %v2565_v8 }
 0x4e1   : > { %2068 = vmatpush3.bf16.msra.mxu0 %v2230_v18  ;;  %v2282_v18 = vld [vmem:[%s3191_s6 + $0x40] sm:$0xff]  }
 0x4e2   : > { %2069 = vmatprep.subr.bf16.mxu0 %v2565_v8 }
 0x4e5   : > { %2070 = vmatpush3.bf16.msra.mxu0 %v2231_v19  ;;  %v2283_v19 = vld [vmem:[%s3191_s6 + $0xc0] sm:$0xff]  }
 0x4e6   : > { %2071 = vmatprep.subr.bf16.mxu0 %v2565_v8 }
 0x4e9   : > { %2072 = vmatpush3.bf16.msra.mxu0 %v2232_v20  ;;  %v2284_v20 = vld [vmem:[%s3191_s6] sm:$0xff]  }
 0x4ea   : > { %2073 = vmatprep.subr.bf16.mxu0 %v2565_v8 }
 0x4ed   : > { %2074 = vmatpush3.bf16.msra.mxu0 %v2233_v21  ;;  %v2285_v21 = vld [vmem:[%s3191_s6 + $0x80] sm:$0xff]  }
 0x4ee   : > { %1161 = vmatprep.subr.bf16.mxu0 %v2239_v35  ;;  %v2299_v35 = vld [vmem:[%s3191_s6 + $0xe0] sm:$0xff]  }
 0x5a3   : > { %v777_v22 = vpop.f32.mrb[8].mxu0 }
 0x5a4   : > { %v783_v23 = vpack.c.bf16 %v777_v22, %v777_v22  ;;  %v2057_v24 = vpop.f32.mrb[9].mxu0  ;;  %v2286_v22 = vld [vmem:[%s3191_s6 + $0x48] sm:$0xff]  }
 0x5a5   : > { %v780_v25 = vpop.f32.mrb[10].mxu0  ;;  %v2288_v24 = vld [vmem:[%s3191_s6 + $0x8] sm:$0xff]  }
 0x5a6   : > { %v2058_v26 = vpop.f32.mrb[11].mxu0  ;;  %2076 = vmatmul.mubr.bf16.vlgmr.msra.gmra.mrb[12].mxu0 %v783_v23  ;;  %v2287_v23 = vld [vmem:[%s3191_s6 + $0xc8] sm:$0xff]  }
 0x5a7   : > { %1193 = vmatprep.mubr.bf16.mxu0 %v2566_v30  ;;  %v2236_v30 = vld [vmem:[%s3189_s4 + $0x4] ss:$16 sps:$4 sm:$0xff]   ;;  %v2289_v25 = vld [vmem:[%s3191_s6 + $0x88] sm:$0xff]  }
 0x5a8   : > { %1120 = vmatprep.subr.bf16.mxu1 %v2236_v30  ;;  %v2290_v26 = vld [vmem:[%s3191_s6 + $0x50] sm:$0xff]   ;;  %v2297_v30 = vld [vmem:[%s3191_s6 + $0x98] sm:$0xff]  }
 0x5a9   : > { %1121 = vmatpush1.bf16.msra.mxu1 %v2234_v34  ;;  %v2296_v34 = vld [vmem:[%s3191_s6 + $0x18] sm:$0xff]  }
 0x5aa   : > { %1122 = vmatprep.subr.bf16.mxu1 %v2242_v36  ;;  %v2300_v36 = vld [vmem:[%s3191_s6 + $0x20] sm:$0xff]  }
 0x5ad   : > { %1123 = vmatpush1.bf16.msra.mxu1 %v2240_v38  ;;  %v2302_v38 = vld [vmem:[%s3191_s6 + $0x68] sm:$0xff]  }
 0x5ae   : > { %1124 = vmatprep.subr.bf16.mxu1 %v2248_v40  ;;  %v2304_v40 = vld [vmem:[%s3191_s6 + $0x28] sm:$0xff]  }
 0x5b1   : > { %1125 = vmatpush1.bf16.msra.mxu1 %v2246_v42  ;;  %v2306_v42 = vld [vmem:[%s3191_s6 + $0x70] sm:$0xff]  }
 0x5b2   : > { %1126 = vmatprep.subr.bf16.mxu1 %v2254_v49  ;;  %v2313_v49 = vld [vmem:[%s3191_s6 + $0xb8] sm:$0xff]  }
 0x5b5   : > { %1127 = vmatpush1.bf16.msra.mxu1 %v2252_v51 }
 0x5b6   : > { %1128 = vmatprep.subr.bf16.mxu1 %v2260_v54 }
 0x5b9   : > { %1129 = vmatpush1.bf16.msra.mxu1 %v2258_v53  ;;  %v938_v53 = vld [vmem:[#allocation8] sm:$0xf] }
 0x5ba   : > { %1130 = vmatprep.subr.bf16.mxu1 %v2266_v57 }
 0x5bd   : > { %1131 = vmatpush1.bf16.msra.mxu1 %v2264_v60 }
 0x5be   : > { %1132 = vmatprep.subr.bf16.mxu1 %v2272_v62 }
 0x5c1   : > { %1133 = vmatpush1.bf16.msra.mxu1 %v2270_v0 }
 0x5c2   : > { %1134 = vmatprep.subr.bf16.mxu1 %v2278_v2 }
 0x5c5   : > { %1135 = vmatpush1.bf16.msra.mxu1 %v2276_v4 }
 0x5c6   : > { %1974 = vmatprep.subr.bf16.mxu1 %v2282_v18 }
 0x679   : > { %v882_v27 = vpop.f32.mrb[12].mxu0 }
 0x67a   : > { %v2925_v28 = vadd.f32 %v882_v27, %v2818_v5  ;;  %v2077_v29 = vpop.f32.mrb[13].mxu0  ;;  %v2237_v5 = vld [vmem:[%s3189_s4 + $0x8] ss:$16 sps:$4 sm:$0xff]   ;;  %v2291_v27 = vld [vmem:[%s3191_s6 + $0xd0] sm:$0xff]  }
 0x67b   : > { %v885_v31 = vpop.f32.mrb[14].mxu0  ;;  %1162 = vmatpush1.bf16.msra.mxu0 %v2237_v5  ;;  %v2292_v29 = vld [vmem:[%s3191_s6 + $0x10] sm:$0xff]   ;;  %v2298_v5 = vld [vmem:[%s3191_s6 + $0x60] sm:$0xff]  }
 0x67c   : > { %v2078_v32 = vpop.f32.mrb[15].mxu0  ;;  %v890_v33 = vsel %vm889_vm5, %v2925_v28, 0.0  ;;  %1163 = vmatprep.subr.bf16.mxu0 %v2245_v37  ;;  %v2293_v31 = vld [vmem:[%s3191_s6 + $0x90] sm:$0xff]   ;;  %v2301_v37 = vld [vmem:[%s3191_s6 + $0xa0] sm:$0xff]  }
 0x67d   : > { %891 = vadd.xlane.f32.xlu0 %v890_v33  ;;  %v2294_v32 = vld [vmem:[%s3191_s6 + $0x58] sm:$0xff]  }
 0x67e   : > { %v2295_v33 = vld [vmem:[%s3191_s6 + $0xd8] sm:$0xff]  }
 0x67f   : > { %1164 = vmatpush1.bf16.msra.mxu0 %v2243_v39  ;;  %v2303_v39 = vld [vmem:[%s3191_s6 + $0xe8] sm:$0xff]  }
 0x680   : > { %1165 = vmatprep.subr.bf16.mxu0 %v2251_v41  ;;  %v2305_v41 = vld [vmem:[%s3191_s6 + $0xa8] sm:$0xff]  }
 0x683   : > { %1166 = vmatpush1.bf16.msra.mxu0 %v2249_v43  ;;  %v2307_v43 = vld [vmem:[%s3191_s6 + $0xf0] sm:$0xff]  }
 0x684   : > { %1167 = vmatprep.subr.bf16.mxu0 %v2257_v50  ;;  %v1101_v50 = vshrl.u32 %v718_v58, 7 }
 0x686   : > { %v1102_v51 = vsub.s32 0, %v1101_v50  ;;  %v1106_v54 = vsub.s32 1, %v1101_v50 }
 0x687   : > { %1168 = vmatpush1.bf16.msra.mxu0 %v2255_v52  ;;  %v1110_v52 = vsub.s32 2, %v1101_v50 }
 0x688   : > { %1169 = vmatprep.subr.bf16.mxu0 %v2263_v56  ;;  %v1103_v56 = vrot.slane %v938_v53, %v1102_v51 }
 0x689   : > { %v1111_v57 = vrot.slane %v938_v53, %v1110_v52 }
 0x68b   : > { %1170 = vmatpush1.bf16.msra.mxu0 %v2261_v55  ;;  %v1114_v55 = vsub.s32 3, %v1101_v50 }
 0x68c   : > { %1171 = vmatprep.subr.bf16.mxu0 %v2269_v59  ;;  %v1107_v59 = vrot.slane %v938_v53, %v1106_v54 }
 0x68d   : > { %v1115_v60 = vrot.slane %v938_v53, %v1114_v55 }
 0x68f   : > { %1172 = vmatpush1.bf16.msra.mxu0 %v2267_v61 }
 0x690   : > { %1173 = vmatprep.subr.bf16.mxu0 %v2275_v63 }
 0x693   : > { %1174 = vmatpush1.bf16.msra.mxu0 %v2273_v1 }
 0x694   : > { %1175 = vmatprep.subr.bf16.mxu0 %v2281_v3 }
 0x697   : > { %1176 = vmatpush1.bf16.msra.mxu0 %v2279_v6 }
 0x698   : > { %1996 = vmatprep.subr.bf16.mxu0 %v2283_v19 }
 0x70a   : > { %v892_v44 = vpop.xlane.xlu0 %891 }
 0x70b   : > { %v893_v45 = vmul.f32 0.0078125, %v892_v44  ;;  %v2308_v44 = vld [vmem:[%s3191_s6 + $0x30] sm:$0xff]  }
 0x70d   : > { %v894_v46 = vsub.f32 %v2925_v28, %v893_v45  ;;  %v2309_v45 = vld [vmem:[%s3191_s6 + $0xb0] sm:$0xff]  }
 0x70f   : > { %v895_v47 = vmul.f32 %v894_v46, %v894_v46 }
 0x711   : > { %v896_v48 = vsel %vm889_vm5, %v895_v47, 0.0  ;;  %v2311_v47 = vld [vmem:[%s3191_s6 + $0xf8] sm:$0xff]  }
 0x712   : > { %897 = vadd.xlane.f32.xlu1 %v896_v48  ;;  %v2312_v48 = vld [vmem:[%s3191_s6 + $0x38] sm:$0xff]  }
 0x79f   : > { %v898_v7 = vpop.xlane.xlu1 %897 }
 0x7a0   : > { %v899_v9 = vmul.f32 0.0078125, %v898_v7 }
 0x7a2   : > { %v900_v10 = vadd.f32 1e-05, %v899_v9 }
 0x7a4   : > { %2328 = vrsqrt.f32 %v900_v10 }
 0x7ae   : > { %v2329_v11 = vpop.eup %2328 }
 0x7af   : > { %v902_v13 = vmul.f32 %v2329_v11, %v894_v46  ;;  %v2310_v46 = vld [vmem:[%s3191_s6 + $0x78] sm:$0xff]  }
 0x7b1   : > { %v903_v15 = vmul.f32 %v902_v13, %v405_v12 }
 0x7b3   : > { %v904_v16 = vadd.f32 %v903_v15, %v406_v14 }
 0x7b5   : > { %v905_v17 = vpack.c.bf16 %v904_v16, %v904_v16 }
 0x7b7   : > { %1153 = vmatmul.mubr.bf16.vlgmr.msra.gmra.mrb[4].mxu1 %v905_v17  ;;  %1194 = vmatmul.mubr.bf16.vlgmr.msra.gmra.mrb[16].mxu0 %v905_v17 }
 0x7b8   : > { %1975 = vmatpush3.bf16.msra.mxu1 %v2284_v20  ;;  %1997 = vmatpush3.bf16.msra.mxu0 %v2285_v21 }
 0x7b9   : > { %1976 = vmatprep.subr.bf16.mxu1 %v2286_v22  ;;  %1998 = vmatprep.subr.bf16.mxu0 %v2287_v23 }
 0x7bc   : > { %1977 = vmatpush3.bf16.msra.mxu1 %v2288_v24  ;;  %1999 = vmatpush3.bf16.msra.mxu0 %v2289_v25 }
 0x7bd   : > { %1978 = vmatprep.subr.bf16.mxu1 %v2290_v26  ;;  %2000 = vmatprep.subr.bf16.mxu0 %v2291_v27 }
 0x7c0   : > { %1979 = vmatpush3.bf16.msra.mxu1 %v2292_v29  ;;  %2001 = vmatpush3.bf16.msra.mxu0 %v2293_v31 }
 0x7c1   : > { %1980 = vmatprep.subr.bf16.mxu1 %v2294_v32  ;;  %2002 = vmatprep.subr.bf16.mxu0 %v2295_v33 }
 0x7c4   : > { %1981 = vmatpush3.bf16.msra.mxu1 %v2296_v34  ;;  %2003 = vmatpush3.bf16.msra.mxu0 %v2297_v30 }
 0x7c5   : > { %1982 = vmatprep.subr.bf16.mxu1 %v2298_v5  ;;  %2004 = vmatprep.subr.bf16.mxu0 %v2299_v35 }
 0x7c8   : > { %1983 = vmatpush3.bf16.msra.mxu1 %v2300_v36  ;;  %2005 = vmatpush3.bf16.msra.mxu0 %v2301_v37 }
 0x7c9   : > { %1984 = vmatprep.subr.bf16.mxu1 %v2302_v38  ;;  %2006 = vmatprep.subr.bf16.mxu0 %v2303_v39 }
 0x7cc   : > { %1985 = vmatpush3.bf16.msra.mxu1 %v2304_v40  ;;  %2007 = vmatpush3.bf16.msra.mxu0 %v2305_v41 }
 0x7cd   : > { %1986 = vmatprep.subr.bf16.mxu1 %v2306_v42  ;;  %2008 = vmatprep.subr.bf16.mxu0 %v2307_v43 }
 0x7d0   : > { %1987 = vmatpush3.bf16.msra.mxu1 %v2308_v44  ;;  %2009 = vmatpush3.bf16.msra.mxu0 %v2309_v45 }
 0x7d1   : > { %1988 = vmatprep.subr.bf16.mxu1 %v2310_v46  ;;  %2010 = vmatprep.subr.bf16.mxu0 %v2311_v47 }
 0x7d4   : > { %1989 = vmatpush3.bf16.msra.mxu1 %v2312_v48  ;;  %2011 = vmatpush3.bf16.msra.mxu0 %v2313_v49 }
 0x7d5   : > { %2079 = vmatprep.subr.bf16.mxu1 %v2565_v8 }
 0x88a   : > { %v1154_v61 = vpop.f32.mrb[4].mxu1  ;;  %v1195_v62 = vpop.f32.mrb[16].mxu0 }
 0x88b   : > { %v1155_v63 = vadd.f32 %v1154_v61, %v1103_v56  ;;  %v1196_v0 = vadd.f32 %v1195_v62, %v1111_v57  ;;  %v1156_v1 = vpop.f32.mrb[5].mxu1  ;;  %v1197_v2 = vpop.f32.mrb[17].mxu0  ;;  %v407_v62 = vld [vmem:[#allocation9 + $0x4] sm:$0x1] }
 0x88c   : > { %v1157_v3 = vadd.f32 %v1156_v1, %v1107_v59  ;;  %v1198_v4 = vadd.f32 %v1197_v2, %v1115_v60  ;;  %v1158_v6 = vpop.f32.mrb[6].mxu1  ;;  %v1199_v7 = vpop.f32.mrb[18].mxu0 }
 0x88d   : > { %v1202_v58 = vmul.f32 %v1155_v63, %v1155_v63  ;;  %v1204_v9 = vmul.f32 %v1196_v0, %v1196_v0  ;;  %v1159_v10 = vpop.f32.mrb[7].mxu1  ;;  %v1200_v11 = vpop.f32.mrb[19].mxu0 }
 0x88e   : > { %v1203_v12 = vmul.f32 %v1157_v3, %v1157_v3  ;;  %v1205_v13 = vmul.f32 %v1198_v4, %v1198_v4  ;;  %v2317_v10 = vld [vmem:[#allocation11 + $0x18] sm:$0xff]   ;;  %v2318_v11 = vld [vmem:[#allocation11 + $0x20] sm:$0xff]  }
 0x88f   : > { %v1206_v14 = vmul.f32 %v1202_v58, %v1155_v63  ;;  %v1208_v15 = vmul.f32 %v1204_v9, %v1196_v0  ;;  %v2314_v58 = vld [vmem:[#allocation11] sm:$0xff]   ;;  %v2315_v9 = vld [vmem:[#allocation11 + $0x8] sm:$0xff]  }
 0x890   : > { %v1207_v16 = vmul.f32 %v1203_v12, %v1157_v3  ;;  %v1209_v17 = vmul.f32 %v1205_v13, %v1198_v4  ;;  %v2319_v12 = vld [vmem:[#allocation11 + $0x28] sm:$0xff]  }
 0x891   : > { %v1210_v18 = vmul.f32 0.044715, %v1206_v14  ;;  %v1212_v19 = vmul.f32 0.044715, %v1208_v15 }
 0x892   : > { %v1211_v20 = vmul.f32 0.044715, %v1207_v16  ;;  %v1213_v21 = vmul.f32 0.044715, %v1209_v17  ;;  %v408_v17 = vld [vmem:[#allocation9 + $0x5] sm:$0x1] }
 0x893   : > { %v1214_v22 = vadd.f32 %v1210_v18, %v1155_v63  ;;  %v1216_v23 = vadd.f32 %v1212_v19, %v1196_v0  ;;  %v409_v19 = vld [vmem:[#allocation9 + $0x6] sm:$0x1] }
 0x894   : > { %v1215_v24 = vadd.f32 %v1211_v20, %v1157_v3  ;;  %v1217_v25 = vadd.f32 %v1213_v21, %v1198_v4 }
 0x895   : > { %v1218_v26 = vmul.f32 0.7978846, %v1214_v22  ;;  %v1220_v27 = vmul.f32 0.7978846, %v1216_v23 }
 0x896   : > { %v1219_v29 = vmul.f32 0.7978846, %v1215_v24  ;;  %v1221_v31 = vmul.f32 0.7978846, %v1217_v25  ;;  %v2320_v24 = vld [vmem:[#allocation11 + $0x30] sm:$0xff]   ;;  %v2321_v25 = vld [vmem:[#allocation11 + $0x38] sm:$0xff]  }
 0x897   : > { %2330 = vtanh.f32 %v1218_v26 }
 0x898   : > { %2332 = vtanh.f32 %v1220_v27 }
 0x899   : > { %2334 = vtanh.f32 %v1219_v29 }
 0x89a   : > { %2336 = vtanh.f32 %v1221_v31 }
 0x8a1   : > { %v2331_v32 = vpop.eup %2330 }
 0x8a2   : > { %v2333_v33 = vpop.eup %2332  ;;  %v1226_v34 = vadd.f32 1.0, %v2331_v32 }
 0x8a3   : > { %v2335_v30 = vpop.eup %2334  ;;  %v1228_v5 = vadd.f32 1.0, %v2333_v33 }
 0x8a4   : > { %v2337_v35 = vpop.eup %2336  ;;  %v1227_v36 = vadd.f32 1.0, %v2335_v30  ;;  %v1230_v37 = vmul.f32 0.5, %v1226_v34 }
 0x8a5   : > { %v1229_v38 = vadd.f32 1.0, %v2337_v35  ;;  %v1232_v39 = vmul.f32 0.5, %v1228_v5 }
 0x8a6   : > { %v1231_v40 = vmul.f32 0.5, %v1227_v36  ;;  %v1234_v42 = vmul.f32 %v1230_v37, %v1155_v63 }
 0x8a7   : > { %v1233_v41 = vmul.f32 0.5, %v1229_v38  ;;  %v1236_v44 = vmul.f32 %v1232_v39, %v1196_v0 }
 0x8a8   : > { %v1235_v43 = vmul.f32 %v1231_v40, %v1157_v3  ;;  %v1238_v48 = vpack.c.bf16 %v1234_v42, %v1234_v42 }
 0x8a9   : > { %v1237_v45 = vmul.f32 %v1233_v41, %v1198_v4  ;;  %v1240_v49 = vpack.c.bf16 %v1236_v44, %v1236_v44 }
 0x8aa   : > { %v1239_v46 = vpack.c.bf16 %v1235_v43, %v1235_v43 }
 0x8ab   : > { %v1241_v47 = vpack.c.bf16 %v1237_v45, %v1237_v45 }
 0x8ac   : > { %1530 = vmatprep.mubr.bf16.mxu1 %v1239_v46 }
 0x8ad   : > { %1570 = vmatprep.mubr.bf16.mxu0 %v1241_v47  ;;  %1531 = vmatmul.mubr.bf16.vlgmr.msra.gmra.mrb[8].mxu1 %v1238_v48 }
 0x8ae   : > { %1571 = vmatmul.mubr.bf16.vlgmr.msra.gmra.mrb[20].mxu0 %v1240_v49  ;;  %2095 = vmatprep.mubr.msk.bf16.mxu1 %vm2567_vm0, %v2565_v8 }
 0x8af   : > { %2080 = vmatpush3.bf16.xpose.msra.mxu1 %v2314_v58 }
 0x8b0   : > { %2081 = vmatprep.subr.bf16.mxu1 %v2565_v8 }
 0x8b7   : > { %2082 = vmatpush3.bf16.xpose.msra.mxu1 %v2315_v9 }
 0x8b8   : > { %2083 = vmatprep.subr.bf16.mxu1 %v2565_v8 }
 0x980   : > { %v1990_v50 = vpop.f32.mrb[8].mxu1 }
 0x981   : > { %v2012_v51 = vpop.f32.mrb[20].mxu0  ;;  %v1991_v52 = vpop.f32.mrb[9].mxu1 }
 0x982   : > { %v1992_v53 = vadd.f32 %v1991_v52, %v1990_v50  ;;  %v2013_v54 = vpop.f32.mrb[21].mxu0  ;;  %v1993_v55 = vpop.f32.mrb[10].mxu1 }
 0x983   : > { %v2014_v56 = vadd.f32 %v2013_v54, %v2012_v51  ;;  %v2015_v57 = vpop.f32.mrb[22].mxu0  ;;  %v1994_v59 = vpop.f32.mrb[11].mxu1 }
 0x984   : > { %v2016_v60 = vpop.f32.mrb[23].mxu0 }
 0x985   : > { %v1573_v61 = vadd.f32 %v2014_v56, %v1992_v53 }
 0x987   : > { %v1578_v63 = vadd.f32 %v1573_v61, %v2925_v28  ;;  %v2316_v28 = vld [vmem:[#allocation11 + $0x10] sm:$0xff]  }
 0x988   : > { %2084 = vmatpush3.bf16.xpose.msra.mxu1 %v2316_v28 }
 0x989   : > { %v1579_v0 = vadd.f32 %v1578_v63, %v407_v62  ;;  %2085 = vmatprep.subr.bf16.mxu1 %v2565_v8 }
 0x98b   : > { %v1580_v1 = vsel %vm889_vm5, %v1579_v0, 0.0 }
 0x98c   : > { %1581 = vadd.xlane.f32.xlu0 %v1580_v1 }
 0x990   : > { %2086 = vmatpush3.bf16.xpose.msra.mxu1 %v2317_v10 }
 0x991   : > { %2087 = vmatprep.subr.bf16.mxu1 %v2565_v8 }
 0x998   : > { %2088 = vmatpush3.bf16.xpose.msra.mxu1 %v2318_v11 }
 0x999   : > { %2089 = vmatprep.subr.bf16.mxu1 %v2565_v8 }
 0x9a0   : > { %2090 = vmatpush3.bf16.xpose.msra.mxu1 %v2319_v12 }
 0x9a1   : > { %2091 = vmatprep.subr.bf16.mxu1 %v2565_v8 }
 0x9a8   : > { %2092 = vmatpush3.bf16.xpose.msra.mxu1 %v2320_v24 }
 0x9a9   : > { %2093 = vmatprep.subr.bf16.mxu1 %v2565_v8 }
 0x9b0   : > { %2094 = vmatpush3.bf16.xpose.msra.mxu1 %v2321_v25 }
 0xa19   : > { %v1582_v2 = vpop.xlane.xlu0 %1581 }
 0xa1a   : > { %v1583_v3 = vmul.f32 0.0078125, %v1582_v2 }
 0xa1c   : > { %v1584_v4 = vsub.f32 %v1579_v0, %v1583_v3 }
 0xa1e   : > { %v1585_v6 = vmul.f32 %v1584_v4, %v1584_v4 }
 0xa20   : > { %v1586_v7 = vsel %vm889_vm5, %v1585_v6, 0.0 }
 0xa21   : > { %1587 = vadd.xlane.f32.xlu1 %v1586_v7 }
 0xaae   : > { %v1588_v13 = vpop.xlane.xlu1 %1587 }
 0xaaf   : > { %v1589_v14 = vmul.f32 0.0078125, %v1588_v13 }
 0xab1   : > { %v1590_v15 = vadd.f32 1e-05, %v1589_v14 }
 0xab3   : > { %2338 = vrsqrt.f32 %v1590_v15 }
 0xabd   : > { %v2339_v16 = vpop.eup %2338 }
 0xabe   : > { %v1592_v18 = vmul.f32 %v2339_v16, %v1584_v4 }
 0xac0   : > { %v1593_v20 = vmul.f32 %v1592_v18, %v408_v17 }
 0xac2   : > { %v1594_v21 = vadd.f32 %v1593_v20, %v409_v19 }
 0xac4   : > { %v1595_v22 = vmul.f32 %v1594_v21, %v1594_v21 }
 0xac6   : > { %v1596_v23 = vsel %vm889_vm5, %v1595_v22, 0.0 }
 0xac7   : > { %1597 = vadd.xlane.f32.xlu0 %v1596_v23 }
 0xb54   : > { %v1598_v26 = vpop.xlane.xlu0 %1597 }
 0xb55   : > { %v1599_v27 = vadd.f32 1e-12, %v1598_v26 }
 0xb57   : > { %2340 = vrsqrt.f32 %v1599_v27 }
 0xb61   : > { %v2341_v29 = vpop.eup %2340 }
 0xb62   : > { %v1601_v31 = vmul.f32 %v2341_v29, %v1594_v21 }
 0xb64   : > { %v1602_v32 = vpack.c.bf16 %v1601_v31, %v1601_v31 }
 0xb66   : > { %2096 = vmatmul.mubr.bf16.vlgmr.msra.gmra.mrb[12].mxu1 %v1602_v32 }
 0xc39   : > { %v1701_v33 = vpop.f32.mrb[12].mxu1 }
 0xc3a   : > { %v1707_v34 = vmul.f32 100.0, %v1701_v33  ;;  %v2097_v30 = vpop.f32.mrb[13].mxu1 }
 0xc3b   : > { %v1704_v8 = vpop.f32.mrb[14].mxu1 }
 0xc3c   : > { %1708 = vst [vmem:[%s389_s26] sm:$0x1] %v1707_v34  ;;  %v2098_v5 = vpop.f32.mrb[15].mxu1 }
 0xc3d   : > { %2495 = shalt.err (!%p2492_p0)
}
 0xc3e   : > { %s2496_s11 = scalar_lea.hbm %s3143_s18, 16  ;;  %s2500_s22 = scalar_lea.hbm %s3194_s9, 32 }
 0xc3f   : > { %p2497_p10 = scmp.ne.s32.totalorder %s3143_s18, %s2496_s11  ;;  %p2501_p4 = scmp.lt.u32.totalorder %s3143_s18, %s3194_s9 }
 0xc40   : > { %p2502_p12 = scmp.lt.u32.totalorder %s2500_s22, %s2496_s11  ;;  %p2504_p8 = scmp.lt.u32.totalorder %s2496_s11, %s3143_s18 }
 0xc41   : > { %p2498_p2 = pnand %p2497_p10, %p3222_p11 }
 0xc42   : > { %p2503_p7 = por %p2502_p12, %p2501_p4 }
 0xc43   : > { %p2499_p3 = pneg %p2498_p2 }
 0xc44   : > { %p2505_p13 = por %p2504_p8, %p2503_p7 }
 0xc46   : > { %p2506_p1 = pnand %p2505_p13, %p2499_p3 }
 0xc48   : > { %2509 = shalt.err (!%p2506_p1)
}
 0xc49   : > { %2119 = dma.vmem_to_hbm [thread:$0]  (%p3222_p11), %s3145_s15, 16, %s3143_s18, %s1710_s21  }
 0xc4a PF: > { %s3223_s29 = sld [smem:[#allocation17_spill]]  ;;  %s3224_s23 = sld [smem:[#allocation21_spill]] }
 0xc4b   : > { %p2151_p6 = scmp.ge.s32.totalorder %s2556_s12, 2 }
 0xc50   : > { %s1734_s26 = sand.u32 1, %s3223_s29   ;;  %p3225_p9 = scmp.ne.s32.totalorder %s3224_s23, 0 }
 0xc51   : > { %s1735_s28 = scalar_lea.sflag [#allocation5], %s1734_s26 }
 0xc52   : > { %p2138_p5 = pnand %p2151_p6, %p3225_p9 }
 0xc54   : > { %2539 = dma.done.wait (!%p2138_p5), %s1735_s28, 16  }
 0xc55   : > { %2541 = vsyncadd (!%p2138_p5), %s1735_s28, 4294967280  ;;  %s3226_s12 = sld [smem:[#allocation19_spill]]  ;;  %s3227_s13 = sld [smem:[#allocation18_spill]] }
 0xc56   : > { %s3228_s11 = sld [smem:[#allocation20_spill]]  ;;  %s3229_s30 = smov %s2548_s10 }
 0xc5b   : > { %p22_p0 = scmp.ge.s32.totalorder %s3226_s12, 4   ;;  %s3230_s10 = smov %s3227_s13 }
 0xc5d   :  { %24 = sbr.rel (!%p22_p0) target bundleno = 6 (0x6), region = 112 }
 0xc64   :  { %1739 = vsyncpa [#allocation4], 1 }
 0xc65   :  { %1741 = vsyncpa [#allocation4 + $0x1], 1 }
 0xc66   :  { %1742 = vsyncpa [#allocation7], 1 }
 0xc67   :  { %1743 = vsyncpa [#allocation10], 1 }
 0xc68   :  { %1744 = vsyncpa [#allocation5], 1 }
 0xc69   :  { %1746 = vsyncpa [#allocation5 + $0x1], 1 }

</bundles_post_ra>
